<compile_context>
chip_gen: v6e
topology: v6e:2x2x1
jax: 0.10.0
libtpu: 0.0.40
codegen_flags: <defaults>
</compile_context>

<pallas_src>
import math
import jax
import jax.numpy as jnp
from jax.experimental import pallas as pl
from jax.experimental.pallas import tpu as pltpu

EPS = 1e-5  # PyTorch nn.LayerNorm default


def _layernorm(x, gamma, beta):
    mu = jnp.mean(x, axis=-1, keepdims=True)
    xc = x - mu
    var = jnp.mean(xc * xc, axis=-1, keepdims=True)
    return xc * jax.lax.rsqrt(var + EPS) * gamma + beta


def make_encoder_layer_kernel(num_heads, block_b, seq_len, d_model):
    H, Bb, S, D = num_heads, block_b, seq_len, d_model
    assert D % H == 0, "d_model must be divisible by num_heads"
    dk = D // H
    rows = Bb * S

    def kernel(q_ref, k_ref, v_ref, bias_ref,
               wq_ref, wk_ref, wv_ref, wo_ref, w1_ref, w2_ref,
               vec_ref, b1_ref, out_ref):
        f32 = jnp.float32
        bf16 = jnp.bfloat16

        # Residual stream and attention inputs packed to (Bb*S, D) rows so every projection
        # and FFN matmul is a single full-width MXU pass over all packed batch elements.
        x = q_ref[...].reshape(rows, D).astype(f32)
        k_in = k_ref[...].reshape(rows, D)          # bf16 (host-cast)
        v_in = v_ref[...].reshape(rows, D)          # bf16 (host-cast)

        # Packed (9, D) bias / LayerNorm slab.
        bq, bk, bv = vec_ref[0:1, :], vec_ref[1:2, :], vec_ref[2:3, :]
        bo, b2 = vec_ref[3:4, :], vec_ref[4:5, :]
        g1, be1 = vec_ref[5:6, :], vec_ref[6:7, :]
        g2, be2 = vec_ref[7:8, :], vec_ref[8:9, :]

        # ---- sublayer 0: x + self_attn(LayerNorm(x), k, v, mask) ----
        xn = _layernorm(x, g1, be1)
        # NOTE: wq/bq are pre-scaled by 1/sqrt(dk) on the host.
        qp = jnp.dot(xn.astype(bf16), wq_ref[...], preferred_element_type=f32) + bq
        kp = jnp.dot(k_in, wk_ref[...], preferred_element_type=f32) + bk
        vp = jnp.dot(v_in, wv_ref[...], preferred_element_type=f32) + bv

        # Heads-batched attention: fold (batch, head) into one leading batch dim so each
        # step is a single 3-D einsum (no per-head lane slices, no masked partial stores).
        def heads(t):  # (rows, D) -> (Bb*H, S, dk), bf16
            return (t.reshape(Bb, S, H, dk).astype(bf16)
                     .transpose(0, 2, 1, 3).reshape(Bb * H, S, dk))

        qh, kh, vh = heads(qp), heads(kp), heads(vp)

        # Additive mask bias (host-precomputed bf16); broadcast over heads once per block.
        neg = jnp.broadcast_to(bias_ref[...].astype(f32)[:, None, :, :],
                               (Bb, H, S, S)).reshape(Bb * H, S, S)

        s = jnp.einsum("bqd,bkd->bqk", qh, kh, preferred_element_type=f32) + neg
        m = jnp.max(s, axis=-1, keepdims=True)
        e = jnp.exp(s - m)
        p = e * pl.reciprocal(jnp.sum(e, axis=-1, keepdims=True), approx=True)
        ctx = jnp.einsum("bqk,bkd->bqd", p.astype(bf16), vh,
                         preferred_element_type=f32)            # (Bb*H, S, dk)
        # Back to lane-dense (rows, D) and straight into the output projection.
        ctx = (ctx.reshape(Bb, H, S, dk).transpose(0, 2, 1, 3)
                  .reshape(rows, D).astype(bf16))

        attn_out = jnp.dot(ctx, wo_ref[...], preferred_element_type=f32) + bo
        # TODO(synk): dropout omitted (eval-mode identity).
        x1 = x + attn_out

        # ---- sublayer 1: x1 + FFN(LayerNorm(x1)) ----
        xn2 = _layernorm(x1, g2, be2)
        h1 = jnp.maximum(
            jnp.dot(xn2.astype(bf16), w1_ref[...], preferred_element_type=f32)
            + b1_ref[0:1, :], 0.0)
        ff = jnp.dot(h1.astype(bf16), w2_ref[...], preferred_element_type=f32) + b2
        out_ref[...] = (x1 + ff).reshape(Bb, S, D).astype(out_ref.dtype)

    return kernel


def _pick_block_b(B, S):
    """Pack several batch elements per grid step (fills MXU rows, amortizes the ~0.35us
    per-step overhead), but keep at least 2 grid steps whenever B >= 2 so both v7x
    TensorCores get work. Block size must divide B."""
    bb = max(1, min(B, 512 // max(S, 1)))
    if B >= 2:
        bb = min(bb, max(1, B // 2))
    while B % bb:
        bb -= 1
    return max(bb, 1)


def _vmem_limit_bytes(bb, S, D, dff):
    """Scoped-VMEM request sized from the actual resident buffers with ~2x headroom,
    clamped to [32 MiB, 64 MiB] so it is valid on every chip (v7x: 64 MiB physical)."""
    weight_bytes = (4 * D * D + 2 * D * dff) * 2                # bf16 weights
    vec_bytes = (9 * D + dff) * 4                               # packed bias/LN slab + b1
    act_bytes = 2 * bb * S * (2 * D * 4 + 2 * D * 2 + S * 2)    # double-buffered act tiles
    tmp_bytes = bb * S * (6 * D + dff) * 4 + bb * S * S * 8     # in-kernel intermediates
    est = weight_bytes + vec_bytes + act_bytes + tmp_bytes
    return int(min(64 << 20, max(32 << 20, 2 * est)))


def encoder_layer(q, k, v, mask, params, num_heads):
    B, S, D = q.shape
    dff = params["w1"].shape[-1]
    dk = D // num_heads
    bb = _pick_block_b(B, S)

    bf16 = jnp.bfloat16
    scale = 1.0 / math.sqrt(dk)

    # One-time host-side prep:
    #  * bf16 weights (MXU-native; half the weight DMA / resident VMEM)
    #  * 1/sqrt(dk) folded into the q projection
    #  * k / v cast to bf16 (only ever feed bf16 matmuls); q stays f32 (residual stream)
    #  * mask converted to a bf16 additive bias
    #  * the nine (1, D)-wide bias / LayerNorm vectors packed into one (9, D) slab
    wq = (params["wq"] * scale).astype(bf16)
    wk = params["wk"].astype(bf16)
    wv = params["wv"].astype(bf16)
    wo = params["wo"].astype(bf16)
    w1 = params["w1"].astype(bf16)
    w2 = params["w2"].astype(bf16)
    k_bf = k.astype(bf16)
    v_bf = v.astype(bf16)
    bias = jnp.where(mask == 0, jnp.float32(-1e9), jnp.float32(0.0)).astype(bf16)
    vecs = jnp.concatenate(
        [params["bq"] * scale, params["bk"], params["bv"], params["bo"], params["b2"],
         params["ln1_g"], params["ln1_b"], params["ln2_g"], params["ln2_b"]],
        axis=0).astype(jnp.float32)                              # (9, D)
    b1 = params["b1"].astype(jnp.float32)

    def batch_spec(shape):
        return pl.BlockSpec((bb,) + shape, lambda i: (i,) + (0,) * len(shape))

    def const_spec(shape):
        # index_map is constant across the grid -> single buffer (default pipelining would
        # double-buffer resident weights for no benefit).
        return pl.BlockSpec(shape, lambda i: (0,) * len(shape),
                            pipeline_mode=pl.Buffered(1))

    in_specs = [
        batch_spec((S, D)), batch_spec((S, D)), batch_spec((S, D)),   # q, k, v
        batch_spec((S, S)),                                           # additive mask bias
        const_spec((D, D)), const_spec((D, D)),                       # wq, wk
        const_spec((D, D)), const_spec((D, D)),                       # wv, wo
        const_spec((D, dff)), const_spec((dff, D)),                   # w1, w2
        const_spec((9, D)), const_spec((1, dff)),                     # packed vecs, b1
    ]

    # TODO(synk): for realistic D/dff/S (e.g. 1024/4096/1k+) the FFN should be K-tiled over a
    # reduction grid axis, the sequence tiled flash-style for the (S,S) scores, and (on v7x)
    # the weights optionally quantized to fp8 so everything fits 64 MiB VMEM; unnecessary at
    # these small sizes.
    return pl.pallas_call(
        make_encoder_layer_kernel(num_heads, bb, S, D),
        out_shape=jax.ShapeDtypeStruct((B, S, D), q.dtype),
        grid=(B // bb,),
        in_specs=in_specs,
        out_specs=pl.BlockSpec((bb, S, D), lambda i: (i, 0, 0)),
        compiler_params=pltpu.CompilerParams(
            dimension_semantics=("parallel",),
            vmem_limit_bytes=_vmem_limit_bytes(bb, S, D, dff),
        ),
    )(q, k_bf, v_bf, bias,
      wq, wk, wv, wo, w1, w2, vecs, b1)


def encoder_layer_ref(q, k, v, mask, p, num_heads):
    """Pure-JAX f32 reference with identical semantics (for correctness check)."""
    def ln(x, g, b):
        mu = jnp.mean(x, -1, keepdims=True)
        var = jnp.mean((x - mu) ** 2, -1, keepdims=True)
        return (x - mu) * jax.lax.rsqrt(var + EPS) * g + b

    B, S, D = q.shape
    dk = D // num_heads
    xn = ln(q, p["ln1_g"][0], p["ln1_b"][0])
    qp = xn @ p["wq"] + p["bq"][0]
    kp = k @ p["wk"] + p["bk"][0]
    vp = v @ p["wv"] + p["bv"][0]

    def split(t):  # (B,S,D) -> (B,H,S,dk)
        return t.reshape(B, S, num_heads, dk).transpose(0, 2, 1, 3)

    qh, kh, vh = split(qp), split(kp), split(vp)
    s = jnp.einsum("bhqd,bhkd->bhqk", qh, kh) / math.sqrt(dk)
    s = jnp.where(mask[:, None, :, :] == 0, -1e9, s)
    a = jax.nn.softmax(s, axis=-1)
    ctx = jnp.einsum("bhqk,bhkd->bhqd", a, vh).transpose(0, 2, 1, 3).reshape(B, S, D)
    x1 = q + (ctx @ p["wo"] + p["bo"][0])
    xn2 = ln(x1, p["ln2_g"][0], p["ln2_b"][0])
    ff = jnp.maximum(xn2 @ p["w1"] + p["b1"][0], 0.0) @ p["w2"] + p["b2"][0]
    return x1 + ff


if __name__ == "__main__":
    B, S, D, H, DFF = 2, 8, 32, 4, 64

    key = jax.random.PRNGKey(0)
    ks = jax.random.split(key, 16)

    def init(k, shape, scale=0.05):
        return (scale * jax.random.normal(k, shape)).astype(jnp.float32)

    params = {
        "wq": init(ks[0], (D, D)), "bq": init(ks[1], (1, D)),
        "wk": init(ks[2], (D, D)), "bk": init(ks[3], (1, D)),
        "wv": init(ks[4], (D, D)), "bv": init(ks[5], (1, D)),
        "wo": init(ks[6], (D, D)), "bo": init(ks[7], (1, D)),
        "ln1_g": jnp.ones((1, D), jnp.float32), "ln1_b": jnp.zeros((1, D), jnp.float32),
        "ln2_g": jnp.ones((1, D), jnp.float32), "ln2_b": jnp.zeros((1, D), jnp.float32),
        "w1": init(ks[8], (D, DFF)), "b1": init(ks[9], (1, DFF)),
        "w2": init(ks[10], (DFF, D)), "b2": init(ks[11], (1, D)),
    }

    q = jax.random.normal(ks[12], (B, S, D), jnp.float32)
    k = jax.random.normal(ks[13], (B, S, D), jnp.float32)
    v = jax.random.normal(ks[14], (B, S, D), jnp.float32)
    # lower-triangular (causal-style) mask: 1 = attend, 0 = masked
    mask = jnp.broadcast_to(jnp.tril(jnp.ones((S, S), jnp.float32)), (B, S, S))

    out = encoder_layer(q, k, v, mask, params, num_heads=H)
    out = jax.block_until_ready(out)

    ref = encoder_layer_ref(q, k, v, mask, params, num_heads=H)
    assert out.shape == (B, S, D)
    # bf16 MXU inputs + approx reciprocal => loosen tolerance vs. the f32 reference
    assert jnp.allclose(out, ref, rtol=2e-2, atol=2e-2), "mismatch vs reference"

    print("KERNEL_OK")
</pallas_src>

<mosaic_0001>
module attributes {stable_mosaic.version = 11 : i64} {
  func.func @kernel(%arg0: i32, %arg1: memref<1x8x32xf32, #tpu.memory_space<vmem>>, %arg2: memref<1x8x32xbf16, #tpu.memory_space<vmem>>, %arg3: memref<1x8x32xbf16, #tpu.memory_space<vmem>>, %arg4: memref<1x8x8xbf16, #tpu.memory_space<vmem>>, %arg5: memref<32x32xbf16, #tpu.memory_space<vmem>>, %arg6: memref<32x32xbf16, #tpu.memory_space<vmem>>, %arg7: memref<32x32xbf16, #tpu.memory_space<vmem>>, %arg8: memref<32x32xbf16, #tpu.memory_space<vmem>>, %arg9: memref<32x64xbf16, #tpu.memory_space<vmem>>, %arg10: memref<64x32xbf16, #tpu.memory_space<vmem>>, %arg11: memref<9x32xf32, #tpu.memory_space<vmem>>, %arg12: memref<1x64xf32, #tpu.memory_space<vmem>>, %arg13: memref<1x8x32xf32, #tpu.memory_space<vmem>>) attributes {dimension_semantics = [#tpu.dimension_semantics<parallel>], iteration_bounds = array<i64: 2>, scalar_prefetch = 0 : i64, scratch_operands = 0 : i64, tpu.core_type = #tpu.core_type<tc>, window_params = [{transform_indices = @transform_0, window_bounds = array<i64: 1, 8, 32>}, {transform_indices = @transform_1, window_bounds = array<i64: 1, 8, 32>}, {transform_indices = @transform_2, window_bounds = array<i64: 1, 8, 32>}, {transform_indices = @transform_3, window_bounds = array<i64: 1, 8, 8>}, {pipeline_mode = #tpu.pipeline_mode<synchronous>, transform_indices = @transform_4, window_bounds = array<i64: 32, 32>}, {pipeline_mode = #tpu.pipeline_mode<synchronous>, transform_indices = @transform_5, window_bounds = array<i64: 32, 32>}, {pipeline_mode = #tpu.pipeline_mode<synchronous>, transform_indices = @transform_6, window_bounds = array<i64: 32, 32>}, {pipeline_mode = #tpu.pipeline_mode<synchronous>, transform_indices = @transform_7, window_bounds = array<i64: 32, 32>}, {pipeline_mode = #tpu.pipeline_mode<synchronous>, transform_indices = @transform_8, window_bounds = array<i64: 32, 64>}, {pipeline_mode = #tpu.pipeline_mode<synchronous>, transform_indices = @transform_9, window_bounds = array<i64: 64, 32>}, {pipeline_mode = #tpu.pipeline_mode<synchronous>, transform_indices = @transform_10, window_bounds = array<i64: 9, 32>}, {pipeline_mode = #tpu.pipeline_mode<synchronous>, transform_indices = @transform_11, window_bounds = array<i64: 1, 64>}, {transform_indices = @transform_12, window_bounds = array<i64: 1, 8, 32>}]} {
    %c0 = arith.constant 0 : index
    %c0_0 = arith.constant 0 : index
    %c0_1 = arith.constant 0 : index
    %0 = vector.load %arg1[%c0, %c0_0, %c0_1] : memref<1x8x32xf32, #tpu.memory_space<vmem>>, vector<1x8x32xf32>
    %1 = vector.shape_cast %0 : vector<1x8x32xf32> to vector<8x32xf32>
    %c0_2 = arith.constant 0 : index
    %c0_3 = arith.constant 0 : index
    %c0_4 = arith.constant 0 : index
    %2 = vector.load %arg2[%c0_2, %c0_3, %c0_4] : memref<1x8x32xbf16, #tpu.memory_space<vmem>>, vector<1x8x32xbf16>
    %3 = vector.shape_cast %2 : vector<1x8x32xbf16> to vector<8x32xbf16>
    %c0_5 = arith.constant 0 : index
    %c0_6 = arith.constant 0 : index
    %c0_7 = arith.constant 0 : index
    %4 = vector.load %arg3[%c0_5, %c0_6, %c0_7] : memref<1x8x32xbf16, #tpu.memory_space<vmem>>, vector<1x8x32xbf16>
    %5 = vector.shape_cast %4 : vector<1x8x32xbf16> to vector<8x32xbf16>
    %c0_8 = arith.constant 0 : index
    %c0_9 = arith.constant 0 : index
    %6 = vector.load %arg11[%c0_8, %c0_9] : memref<9x32xf32, #tpu.memory_space<vmem>>, vector<1x32xf32>
    %c1 = arith.constant 1 : index
    %c0_10 = arith.constant 0 : index
    %7 = vector.load %arg11[%c1, %c0_10] : memref<9x32xf32, #tpu.memory_space<vmem>>, vector<1x32xf32>
    %c2 = arith.constant 2 : index
    %c0_11 = arith.constant 0 : index
    %8 = vector.load %arg11[%c2, %c0_11] : memref<9x32xf32, #tpu.memory_space<vmem>>, vector<1x32xf32>
    %c3 = arith.constant 3 : index
    %c0_12 = arith.constant 0 : index
    %9 = vector.load %arg11[%c3, %c0_12] : memref<9x32xf32, #tpu.memory_space<vmem>>, vector<1x32xf32>
    %c4 = arith.constant 4 : index
    %c0_13 = arith.constant 0 : index
    %10 = vector.load %arg11[%c4, %c0_13] : memref<9x32xf32, #tpu.memory_space<vmem>>, vector<1x32xf32>
    %c5 = arith.constant 5 : index
    %c0_14 = arith.constant 0 : index
    %11 = vector.load %arg11[%c5, %c0_14] : memref<9x32xf32, #tpu.memory_space<vmem>>, vector<1x32xf32>
    %c6 = arith.constant 6 : index
    %c0_15 = arith.constant 0 : index
    %12 = vector.load %arg11[%c6, %c0_15] : memref<9x32xf32, #tpu.memory_space<vmem>>, vector<1x32xf32>
    %c7 = arith.constant 7 : index
    %c0_16 = arith.constant 0 : index
    %13 = vector.load %arg11[%c7, %c0_16] : memref<9x32xf32, #tpu.memory_space<vmem>>, vector<1x32xf32>
    %c8 = arith.constant 8 : index
    %c0_17 = arith.constant 0 : index
    %14 = vector.load %arg11[%c8, %c0_17] : memref<9x32xf32, #tpu.memory_space<vmem>>, vector<1x32xf32>
    %cst = arith.constant dense<0.000000e+00> : vector<8xf32>
    %15 = vector.multi_reduction <add>, %1, %cst [1] : vector<8x32xf32> to vector<8xf32>
    %16 = vector.shape_cast %15 : vector<8xf32> to vector<8x1xf32>
    %cst_18 = arith.constant 3.200000e+01 : f32
    %17 = vector.broadcast %cst_18 : f32 to vector<8x1xf32>
    %18 = arith.divf %16, %17 : vector<8x1xf32>
    %19 = vector.broadcast %18 : vector<8x1xf32> to vector<8x32xf32>
    %20 = arith.subf %1, %19 : vector<8x32xf32>
    %21 = arith.mulf %20, %20 : vector<8x32xf32>
    %cst_19 = arith.constant dense<0.000000e+00> : vector<8xf32>
    %22 = vector.multi_reduction <add>, %21, %cst_19 [1] : vector<8x32xf32> to vector<8xf32>
    %23 = vector.shape_cast %22 : vector<8xf32> to vector<8x1xf32>
    %cst_20 = arith.constant 3.200000e+01 : f32
    %24 = vector.broadcast %cst_20 : f32 to vector<8x1xf32>
    %25 = arith.divf %23, %24 : vector<8x1xf32>
    %cst_21 = arith.constant 9.99999974E-6 : f32
    %26 = vector.broadcast %cst_21 : f32 to vector<8x1xf32>
    %27 = arith.addf %25, %26 : vector<8x1xf32>
    %28 = math.rsqrt %27 : vector<8x1xf32>
    %29 = vector.broadcast %28 : vector<8x1xf32> to vector<8x32xf32>
    %30 = arith.mulf %20, %29 : vector<8x32xf32>
    %31 = vector.broadcast %11 : vector<1x32xf32> to vector<8x32xf32>
    %32 = arith.mulf %30, %31 : vector<8x32xf32>
    %33 = vector.broadcast %12 : vector<1x32xf32> to vector<8x32xf32>
    %34 = arith.addf %32, %33 : vector<8x32xf32>
    %35 = arith.truncf %34 : vector<8x32xf32> to vector<8x32xbf16>
    %c0_22 = arith.constant 0 : index
    %c0_23 = arith.constant 0 : index
    %36 = vector.load %arg5[%c0_22, %c0_23] : memref<32x32xbf16, #tpu.memory_space<vmem>>, vector<32x32xbf16>
    %cst_24 = arith.constant dense<0.000000e+00> : vector<8x32xf32>
    %37 = tpu.matmul %35, %36, %cst_24 {dimension_numbers = #tpu.dot_dimension_numbers<[1], [0], [0], [1], [0, 0, 1, 1], [], []>} : vector<8x32xbf16>, vector<32x32xbf16>, vector<8x32xf32> -> vector<8x32xf32>
    %38 = vector.broadcast %6 : vector<1x32xf32> to vector<8x32xf32>
    %39 = arith.addf %37, %38 : vector<8x32xf32>
    %c0_25 = arith.constant 0 : index
    %c0_26 = arith.constant 0 : index
    %40 = vector.load %arg6[%c0_25, %c0_26] : memref<32x32xbf16, #tpu.memory_space<vmem>>, vector<32x32xbf16>
    %cst_27 = arith.constant dense<0.000000e+00> : vector<8x32xf32>
    %41 = tpu.matmul %3, %40, %cst_27 {dimension_numbers = #tpu.dot_dimension_numbers<[1], [0], [0], [1], [0, 0, 1, 1], [], []>} : vector<8x32xbf16>, vector<32x32xbf16>, vector<8x32xf32> -> vector<8x32xf32>
    %42 = vector.broadcast %7 : vector<1x32xf32> to vector<8x32xf32>
    %43 = arith.addf %41, %42 : vector<8x32xf32>
    %c0_28 = arith.constant 0 : index
    %c0_29 = arith.constant 0 : index
    %44 = vector.load %arg7[%c0_28, %c0_29] : memref<32x32xbf16, #tpu.memory_space<vmem>>, vector<32x32xbf16>
    %cst_30 = arith.constant dense<0.000000e+00> : vector<8x32xf32>
    %45 = tpu.matmul %5, %44, %cst_30 {dimension_numbers = #tpu.dot_dimension_numbers<[1], [0], [0], [1], [0, 0, 1, 1], [], []>} : vector<8x32xbf16>, vector<32x32xbf16>, vector<8x32xf32> -> vector<8x32xf32>
    %46 = vector.broadcast %8 : vector<1x32xf32> to vector<8x32xf32>
    %47 = arith.addf %45, %46 : vector<8x32xf32>
    %48 = vector.shape_cast %39 : vector<8x32xf32> to vector<1x8x4x8xf32>
    %49 = arith.truncf %48 : vector<1x8x4x8xf32> to vector<1x8x4x8xbf16>
    %50 = tpu.transpose %49, [0, 2, 1, 3] : vector<1x8x4x8xbf16> -> vector<1x4x8x8xbf16>
    %51 = vector.shape_cast %50 : vector<1x4x8x8xbf16> to vector<4x8x8xbf16>
    %52 = vector.shape_cast %43 : vector<8x32xf32> to vector<1x8x4x8xf32>
    %53 = arith.truncf %52 : vector<1x8x4x8xf32> to vector<1x8x4x8xbf16>
    %54 = tpu.transpose %53, [0, 2, 1, 3] : vector<1x8x4x8xbf16> -> vector<1x4x8x8xbf16>
    %55 = vector.shape_cast %54 : vector<1x4x8x8xbf16> to vector<4x8x8xbf16>
    %56 = vector.shape_cast %47 : vector<8x32xf32> to vector<1x8x4x8xf32>
    %57 = arith.truncf %56 : vector<1x8x4x8xf32> to vector<1x8x4x8xbf16>
    %58 = tpu.transpose %57, [0, 2, 1, 3] : vector<1x8x4x8xbf16> -> vector<1x4x8x8xbf16>
    %59 = vector.shape_cast %58 : vector<1x4x8x8xbf16> to vector<4x8x8xbf16>
    %c0_31 = arith.constant 0 : index
    %c0_32 = arith.constant 0 : index
    %c0_33 = arith.constant 0 : index
    %60 = vector.load %arg4[%c0_31, %c0_32, %c0_33] : memref<1x8x8xbf16, #tpu.memory_space<vmem>>, vector<1x8x8xbf16>
    %61 = arith.extf %60 : vector<1x8x8xbf16> to vector<1x8x8xf32>
    %62 = vector.shape_cast %61 : vector<1x8x8xf32> to vector<1x1x8x8xf32>
    %63 = vector.shape_cast %62 : vector<1x1x8x8xf32> to vector<1x1x8x8xf32>
    %64 = vector.broadcast %63 : vector<1x1x8x8xf32> to vector<1x4x8x8xf32>
    %65 = vector.shape_cast %64 : vector<1x4x8x8xf32> to vector<4x8x8xf32>
    "tpu.trace_start"() <{level = 10 : i32, message = "bqd,bkd->bqk"}> : () -> ()
    %cst_34 = arith.constant dense<0.000000e+00> : vector<4x8x8xf32>
    %66 = tpu.matmul %51, %55, %cst_34 {dimension_numbers = #tpu.dot_dimension_numbers<[2], [2], [1], [1], [0, 0, 0, 1, 1, 1], [0], [0]>} : vector<4x8x8xbf16>, vector<4x8x8xbf16>, vector<4x8x8xf32> -> vector<4x8x8xf32>
    "tpu.trace_stop"() : () -> ()
    %67 = arith.addf %66, %65 : vector<4x8x8xf32>
    %cst_35 = arith.constant dense<0xFF800000> : vector<4x8xf32>
    %68 = vector.multi_reduction <maximumf>, %67, %cst_35 [2] : vector<4x8x8xf32> to vector<4x8xf32>
    %69 = vector.shape_cast %68 : vector<4x8xf32> to vector<4x8x1xf32>
    %70 = vector.broadcast %69 : vector<4x8x1xf32> to vector<4x8x8xf32>
    %71 = arith.subf %67, %70 : vector<4x8x8xf32>
    %72 = math.exp %71 : vector<4x8x8xf32>
    %cst_36 = arith.constant dense<0.000000e+00> : vector<4x8xf32>
    %73 = vector.multi_reduction <add>, %72, %cst_36 [2] : vector<4x8x8xf32> to vector<4x8xf32>
    %74 = vector.shape_cast %73 : vector<4x8xf32> to vector<4x8x1xf32>
    %75 = tpu.reciprocal %74 {approx = true} : vector<4x8x1xf32> -> vector<4x8x1xf32>
    %76 = vector.broadcast %75 : vector<4x8x1xf32> to vector<4x8x8xf32>
    %77 = arith.mulf %72, %76 : vector<4x8x8xf32>
    %78 = arith.truncf %77 : vector<4x8x8xf32> to vector<4x8x8xbf16>
    "tpu.trace_start"() <{level = 10 : i32, message = "bqk,bkd->bqd"}> : () -> ()
    %cst_37 = arith.constant dense<0.000000e+00> : vector<4x8x8xf32>
    %79 = tpu.matmul %78, %59, %cst_37 {dimension_numbers = #tpu.dot_dimension_numbers<[2], [1], [1], [2], [0, 0, 0, 1, 1, 2], [0], [0]>} : vector<4x8x8xbf16>, vector<4x8x8xbf16>, vector<4x8x8xf32> -> vector<4x8x8xf32>
    "tpu.trace_stop"() : () -> ()
    %80 = vector.shape_cast %79 : vector<4x8x8xf32> to vector<1x4x8x8xf32>
    %81 = tpu.transpose %80, [0, 2, 1, 3] : vector<1x4x8x8xf32> -> vector<1x8x4x8xf32>
    %82 = vector.shape_cast %81 : vector<1x8x4x8xf32> to vector<8x32xf32>
    %83 = arith.truncf %82 : vector<8x32xf32> to vector<8x32xbf16>
    %c0_38 = arith.constant 0 : index
    %c0_39 = arith.constant 0 : index
    %84 = vector.load %arg8[%c0_38, %c0_39] : memref<32x32xbf16, #tpu.memory_space<vmem>>, vector<32x32xbf16>
    %cst_40 = arith.constant dense<0.000000e+00> : vector<8x32xf32>
    %85 = tpu.matmul %83, %84, %cst_40 {dimension_numbers = #tpu.dot_dimension_numbers<[1], [0], [0], [1], [0, 0, 1, 1], [], []>} : vector<8x32xbf16>, vector<32x32xbf16>, vector<8x32xf32> -> vector<8x32xf32>
    %86 = vector.broadcast %9 : vector<1x32xf32> to vector<8x32xf32>
    %87 = arith.addf %85, %86 : vector<8x32xf32>
    %88 = arith.addf %1, %87 : vector<8x32xf32>
    %cst_41 = arith.constant dense<0.000000e+00> : vector<8xf32>
    %89 = vector.multi_reduction <add>, %88, %cst_41 [1] : vector<8x32xf32> to vector<8xf32>
    %90 = vector.shape_cast %89 : vector<8xf32> to vector<8x1xf32>
    %cst_42 = arith.constant 3.200000e+01 : f32
    %91 = vector.broadcast %cst_42 : f32 to vector<8x1xf32>
    %92 = arith.divf %90, %91 : vector<8x1xf32>
    %93 = vector.broadcast %92 : vector<8x1xf32> to vector<8x32xf32>
    %94 = arith.subf %88, %93 : vector<8x32xf32>
    %95 = arith.mulf %94, %94 : vector<8x32xf32>
    %cst_43 = arith.constant dense<0.000000e+00> : vector<8xf32>
    %96 = vector.multi_reduction <add>, %95, %cst_43 [1] : vector<8x32xf32> to vector<8xf32>
    %97 = vector.shape_cast %96 : vector<8xf32> to vector<8x1xf32>
    %cst_44 = arith.constant 3.200000e+01 : f32
    %98 = vector.broadcast %cst_44 : f32 to vector<8x1xf32>
    %99 = arith.divf %97, %98 : vector<8x1xf32>
    %cst_45 = arith.constant 9.99999974E-6 : f32
    %100 = vector.broadcast %cst_45 : f32 to vector<8x1xf32>
    %101 = arith.addf %99, %100 : vector<8x1xf32>
    %102 = math.rsqrt %101 : vector<8x1xf32>
    %103 = vector.broadcast %102 : vector<8x1xf32> to vector<8x32xf32>
    %104 = arith.mulf %94, %103 : vector<8x32xf32>
    %105 = vector.broadcast %13 : vector<1x32xf32> to vector<8x32xf32>
    %106 = arith.mulf %104, %105 : vector<8x32xf32>
    %107 = vector.broadcast %14 : vector<1x32xf32> to vector<8x32xf32>
    %108 = arith.addf %106, %107 : vector<8x32xf32>
    %109 = arith.truncf %108 : vector<8x32xf32> to vector<8x32xbf16>
    %c0_46 = arith.constant 0 : index
    %c0_47 = arith.constant 0 : index
    %110 = vector.load %arg9[%c0_46, %c0_47] : memref<32x64xbf16, #tpu.memory_space<vmem>>, vector<32x64xbf16>
    %cst_48 = arith.constant dense<0.000000e+00> : vector<8x64xf32>
    %111 = tpu.matmul %109, %110, %cst_48 {dimension_numbers = #tpu.dot_dimension_numbers<[1], [0], [0], [1], [0, 0, 1, 1], [], []>} : vector<8x32xbf16>, vector<32x64xbf16>, vector<8x64xf32> -> vector<8x64xf32>
    %c0_49 = arith.constant 0 : index
    %c0_50 = arith.constant 0 : index
    %112 = vector.load %arg12[%c0_49, %c0_50] : memref<1x64xf32, #tpu.memory_space<vmem>>, vector<1x64xf32>
    %113 = vector.broadcast %112 : vector<1x64xf32> to vector<8x64xf32>
    %114 = arith.addf %111, %113 : vector<8x64xf32>
    %cst_51 = arith.constant 0.000000e+00 : f32
    %115 = vector.broadcast %cst_51 : f32 to vector<8x64xf32>
    %116 = arith.maximumf %114, %115 : vector<8x64xf32>
    %117 = arith.truncf %116 : vector<8x64xf32> to vector<8x64xbf16>
    %c0_52 = arith.constant 0 : index
    %c0_53 = arith.constant 0 : index
    %118 = vector.load %arg10[%c0_52, %c0_53] : memref<64x32xbf16, #tpu.memory_space<vmem>>, vector<64x32xbf16>
    %cst_54 = arith.constant dense<0.000000e+00> : vector<8x32xf32>
    %119 = tpu.matmul %117, %118, %cst_54 {dimension_numbers = #tpu.dot_dimension_numbers<[1], [0], [0], [1], [0, 0, 1, 1], [], []>} : vector<8x64xbf16>, vector<64x32xbf16>, vector<8x32xf32> -> vector<8x32xf32>
    %120 = vector.broadcast %10 : vector<1x32xf32> to vector<8x32xf32>
    %121 = arith.addf %119, %120 : vector<8x32xf32>
    %122 = arith.addf %88, %121 : vector<8x32xf32>
    %123 = vector.shape_cast %122 : vector<8x32xf32> to vector<1x8x32xf32>
    %c0_55 = arith.constant 0 : index
    %c0_56 = arith.constant 0 : index
    %c0_57 = arith.constant 0 : index
    %124 = vector.load %arg13[%c0_55, %c0_56, %c0_57] : memref<1x8x32xf32, #tpu.memory_space<vmem>>, vector<1x8x32xf32>
    tpu.vector_store %arg13[%c0_55, %c0_56, %c0_57], %123 {strides = array<i32>} : memref<1x8x32xf32, #tpu.memory_space<vmem>>, vector<1x8x32xf32>,
    return
  }
  func.func @transform_0(%arg0: i32) -> (i32, i32, i32) {
    %c0_i32 = arith.constant 0 : i32
    %c0_i32_0 = arith.constant 0 : i32
    %c0_i32_1 = arith.constant 0 : i32
    return %arg0, %c0_i32, %c0_i32_0 : i32, i32, i32
  }
  func.func @transform_1(%arg0: i32) -> (i32, i32, i32) {
    %c0_i32 = arith.constant 0 : i32
    %c0_i32_0 = arith.constant 0 : i32
    %c0_i32_1 = arith.constant 0 : i32
    return %arg0, %c0_i32, %c0_i32_0 : i32, i32, i32
  }
  func.func @transform_2(%arg0: i32) -> (i32, i32, i32) {
    %c0_i32 = arith.constant 0 : i32
    %c0_i32_0 = arith.constant 0 : i32
    %c0_i32_1 = arith.constant 0 : i32
    return %arg0, %c0_i32, %c0_i32_0 : i32, i32, i32
  }
  func.func @transform_3(%arg0: i32) -> (i32, i32, i32) {
    %c0_i32 = arith.constant 0 : i32
    %c0_i32_0 = arith.constant 0 : i32
    %c0_i32_1 = arith.constant 0 : i32
    return %arg0, %c0_i32, %c0_i32_0 : i32, i32, i32
  }
  func.func @transform_4(%arg0: i32) -> (i32, i32) {
    %c0_i32 = arith.constant 0 : i32
    %c0_i32_0 = arith.constant 0 : i32
    %c0_i32_1 = arith.constant 0 : i32
    return %c0_i32, %c0_i32_0 : i32, i32
  }
  func.func @transform_5(%arg0: i32) -> (i32, i32) {
    %c0_i32 = arith.constant 0 : i32
    %c0_i32_0 = arith.constant 0 : i32
    %c0_i32_1 = arith.constant 0 : i32
    return %c0_i32, %c0_i32_0 : i32, i32
  }
  func.func @transform_6(%arg0: i32) -> (i32, i32) {
    %c0_i32 = arith.constant 0 : i32
    %c0_i32_0 = arith.constant 0 : i32
    %c0_i32_1 = arith.constant 0 : i32
    return %c0_i32, %c0_i32_0 : i32, i32
  }
  func.func @transform_7(%arg0: i32) -> (i32, i32) {
    %c0_i32 = arith.constant 0 : i32
    %c0_i32_0 = arith.constant 0 : i32
    %c0_i32_1 = arith.constant 0 : i32
    return %c0_i32, %c0_i32_0 : i32, i32
  }
  func.func @transform_8(%arg0: i32) -> (i32, i32) {
    %c0_i32 = arith.constant 0 : i32
    %c0_i32_0 = arith.constant 0 : i32
    %c0_i32_1 = arith.constant 0 : i32
    return %c0_i32, %c0_i32_0 : i32, i32
  }
  func.func @transform_9(%arg0: i32) -> (i32, i32) {
    %c0_i32 = arith.constant 0 : i32
    %c0_i32_0 = arith.constant 0 : i32
    %c0_i32_1 = arith.constant 0 : i32
    return %c0_i32, %c0_i32_0 : i32, i32
  }
  func.func @transform_10(%arg0: i32) -> (i32, i32) {
    %c0_i32 = arith.constant 0 : i32
    %c0_i32_0 = arith.constant 0 : i32
    %c0_i32_1 = arith.constant 0 : i32
    return %c0_i32, %c0_i32_0 : i32, i32
  }
  func.func @transform_11(%arg0: i32) -> (i32, i32) {
    %c0_i32 = arith.constant 0 : i32
    %c0_i32_0 = arith.constant 0 : i32
    %c0_i32_1 = arith.constant 0 : i32
    return %c0_i32, %c0_i32_0 : i32, i32
  }
  func.func @transform_12(%arg0: i32) -> (i32, i32, i32) {
    %c0_i32 = arith.constant 0 : i32
    %c0_i32_0 = arith.constant 0 : i32
    %c0_i32_1 = arith.constant 0 : i32
    return %arg0, %c0_i32, %c0_i32_0 : i32, i32, i32
  }
}

</mosaic_0001>

<bundles_post_ra>
// kernel: tpu_custom_call.1
= control target key start
LH: loop header
LB: loop body
LE: loop exit
PB: predicated region body
PF: predicated region fallthrough
CT: control target
= control target key end

     0   :  { %s3434_s0 = inlined_call_operand.vmem [shape: f32[2,8,32], index: 0, kind: input, shape index: {}]   ;;  %s3435_s1 = inlined_call_operand.hbm [shape: bf16[2,8,32], index: 1, kind: input, shape index: {}]   ;;  %s3436_s2 = inlined_call_operand.hbm [shape: bf16[2,8,32], index: 2, kind: input, shape index: {}]   ;;  %s3437_s3 = inlined_call_operand.hbm [shape: bf16[2,8,8], index: 3, kind: input, shape index: {}]   ;;  %s3438_s4 = inlined_call_operand.vmem [shape: bf16[32,32], index: 4, kind: input, shape index: {}]   ;;  %s3439_s5 = inlined_call_operand.vmem [shape: bf16[32,32], index: 5, kind: input, shape index: {}]   ;;  %s3440_s6 = inlined_call_operand.hbm [shape: bf16[32,32], index: 6, kind: input, shape index: {}]   ;;  %s3441_s7 = inlined_call_operand.hbm [shape: bf16[32,32], index: 7, kind: input, shape index: {}]   ;;  %s3442_s8 = inlined_call_operand.hbm [shape: bf16[32,64], index: 8, kind: input, shape index: {}]   ;;  %s3443_s9 = inlined_call_operand.vmem [shape: bf16[64,32], index: 9, kind: input, shape index: {}]   ;;  %s3444_s10 = inlined_call_operand.vmem [shape: f32[9,32], index: 10, kind: input, shape index: {}]   ;;  %s3445_s11 = inlined_call_operand.vmem [shape: f32[1,64], index: 11, kind: input, shape index: {}]   ;;  %s3446_s12 = inlined_call_operand.hbm [shape: f32[2,8,32], index: 12, kind: output, shape index: {}]  }
   0x1   :  { %3469 = sst [smem:[#allocation25_spill]] %s3436_s2 }
   0x2   :  { %3470 = sst [smem:[#allocation26_spill]] %s3440_s6 }
   0x3   :  { %3471 = sst [smem:[#allocation27_spill]] %s3443_s9 }
   0x4   :  { %3472 = sst [smem:[#allocation28_spill]] %s3444_s10 }
   0x5   :  { %3473 = sst [smem:[#allocation29_spill]] %s3445_s11 }
   0x6   :  { %3474 = sst [smem:[#allocation30_spill]] %s3446_s12 }
   0x7   :  { %17 = vsyncpa [#allocation3], 0 }
   0x8   :  { %19 = vsyncpa [#allocation3 + $0x1], 0 }
   0x9   :  { %20 = vsyncpa [#allocation6], 0 }
   0xa   :  { %22 = vsyncpa [#allocation6 + $0x1], 0 }
   0xb   :  { %23 = vsyncpa [#allocation9], 0 }
   0xc   :  { %24 = vsyncpa [#allocation12], 0 }
   0xd   :  { %25 = vsyncpa [#allocation4], 0 }
   0xe   :  { %27 = vsyncpa [#allocation4 + $0x1], 0  ;;  %s2885_s21 = smov 0   ;;  %s2887_s22 = smov 0  }
   0xf   :  { %s2889_s23 = smov 0   ;;  %s2891_s24 = smov 0  }
  0x10 LB: > { %3475 = sst [smem:[#allocation19_spill]] %s2786_s21  ;;  %s2906_s25 = sadd.s32 4294967295, %s2798_s24   ;;  %s2798_s24 = sphi %s2891_s24, %s3513_s24   ;;  %s2794_s23 = sphi %s2889_s23, %s3517_s23   ;;  %s2790_s22 = sphi %s2887_s22, %s3516_s22   ;;  %s2786_s21 = sphi %s2885_s21, %s3515_s21  }
  0x11   : > { %3476 = sst [smem:[#allocation20_spill]] %s2798_s24  ;;  %s2213_s26 = sadd.s32 4294967294, %s2798_s24  }
  0x12   : > { %p79_p0 = scmp.ne.s32.totalorder %s2790_s22, %s2786_s21  ;;  %p3460_p1 = scmp.eq.s32.totalorder %s2906_s25, 0 }
  0x13   : > { %p323_p2 = scmp.eq.s32.totalorder %s2906_s25, 1  ;;  %p329_p3 = scmp.eq.s32.totalorder %s2213_s26, 1 }
  0x14   : > { %p2915_p4 = por %p3460_p1, %p79_p0  ;;  %p2214_p5 = scmp.ge.s32.totalorder %s2798_s24, 1 }
  0x15   : > { %p2920_p6 = por %p329_p3, %p79_p0  ;;  %p336_p7 = scmp.lt.s32.totalorder %s2798_s24, 3 }
  0x16   : > { %s3477_s27 = scalar_select %p2915_p4, 1, 0 }
  0x17   : > { %s3478_s28 = scalar_select %p2920_p6, 1, 0 }
  0x18   : > { %p2925_p8 = pnand %p2214_p5, %p336_p7  ;;  %s2800_s30 = smov [#allocation8]  }
  0x19   : > { %3479 = sst [smem:[#allocation21_spill]] %s3478_s28  ;;  %s354_s13 = sshll.u32 %s2800_s30, 4  ;;  %s355_s13 = int_to_ptr.vmem [resolvable:$true] %s354_s13 }
  0x1a   : > { %s3480_s29 = scalar_select %p2925_p8, 1, 0 }
  0x1b   : > { %p2446_p9 = pneg %p2925_p8  ;;  %s2939_s15 = sadd.s32 1, %s2798_s24  }
  0x1c   : > { %3482 = sst [smem:[#allocation22_spill]] %s2939_s15  ;;  %s66_s16 = sadd.s32 1, %s2794_s23 }
  0x1d   : > { %p2934_p11 = pnand %p2446_p9, %p3460_p1  ;;  %s63_s17 = ssub.s32 %s2798_s24, %s2939_s15 }
  0x1e   : > { %s2571_s18 = scalar_lea.vmem %s355_s13, 256  ;;  %p2579_p5 = scmp.lt.s32.totalorder %s355_s13, %s355_s13 }
  0x1f   : > { %s3481_s14 = scalar_select %p2934_p11, 1, 0 }
  0x20   : > { %p3461_p12 = pneg %p2934_p11  ;;  %p2572_p13 = scmp.ne.s32.totalorder %s355_s13, %s2571_s18 }
  0x21   : > { %p2580_p7 = scmp.lt.s32.totalorder %s2571_s18, %s2571_s18 }
  0x22   : > { %p2574_p0 = pnand %p2572_p13, %p3461_p12 }
  0x23   : > { %p2581_p9 = por %p2580_p7, %p2579_p5 }
  0x24   : > { %p2575_p3 = pneg %p2574_p0 }
  0x26   : > { %p2582_p10 = pnand %p2581_p9, %p2575_p3 }
  0x28   : > { %2585 = shalt.err (!%p2582_p10)
}
  0x29   : > { %s3452_s19 = smov 64   ;;  %s3454_s20 = smov 4  }
  0x2a   : > { %s3483_s6 = sld [smem:[#allocation26_spill]]  ;;  %p64_p10 = scmp.eq.s32.totalorder %s63_s17, 0 }
  0x2b   : > { %p73_p13 = scmp.ne.s32.totalorder %s2794_s23, %s2790_s22  ;;  %p74_p0 = scmp.eq.s32.totalorder %s2798_s24, 0 }
  0x2c   : > { %p2473_p3 = scmp.lt.s32.totalorder %s2798_s24, 2  ;;  %s3456_s28 = sand.u32 1, %s2794_s23  }
  0x2d   : > { %s2962_s18 = scalar_select %p64_p10, %s2794_s23, %s66_s16  }
  0x2e   : > { %p75_p5 = por %p74_p0, %p73_p13  ;;  %p2966_p7 = por %p323_p2, %p73_p13 }
  0x2f   : > { %3484 = sst [smem:[#allocation23_spill]] %s2962_s18  ;;  %s2972_s21 = sshll.u32 %s2798_s24, 6 }
  0x30   : > { %2449 = dma.hbm_to_vmem [thread:$0]  (!%p2934_p11), %s3483_s6, 256, %s355_s13, [#allocation9], %s3452_s19, %s3452_s19, %s3454_s20  }
  0x31   : > { %s3485_s15 = scalar_select %p2966_p7, 1, 0 }
  0x32   : > { %s2976_s12 = sshll.u32 %s3456_s28, 2  ;;  %p2978_p9 = pnand %p2473_p3, %p75_p5 }
  0x33   : > { %3486 = sst [smem:[#allocation24_spill]] %s3485_s15  ;;  %s428_s16 = sand.u32 1, %s2798_s24  }
  0x34   : > { %s3488_s2 = sld [smem:[#allocation25_spill]]  ;;  %s432_s19 = scalar_lea.vmem [#allocation5], %s2976_s12 }
  0x35   : > { %s439_s20 = sshll.u32 %s432_s19, 4  ;;  %s2990_s28 = scalar_lea.sflag [#allocation6], %s428_s16  ;;  %s440_s20 = int_to_ptr.vmem [resolvable:$true] %s439_s20 }
  0x36   : > { %p2996_p10 = pneg %p2978_p9 }
  0x3a   : > { %s2987_s30 = scalar_lea.hbm %s3488_s2, %s2972_s21  ;;  %s2591_s24 = scalar_lea.hbm %s3488_s2, 128 }
  0x3b   : > { %s2586_s6 = scalar_lea.hbm %s2987_s30, 64  ;;  %p2592_p3 = scmp.lt.s32.totalorder %s2987_s30, %s3488_s2 }
  0x3c   : > { %p2587_p2 = scmp.ne.s32.totalorder %s2987_s30, %s2586_s6  ;;  %p2593_p5 = scmp.lt.s32.totalorder %s2591_s24, %s2586_s6 }
  0x3e   : > { %p2589_p13 = pnand %p2996_p10, %p2587_p2  ;;  %p2594_p1 = por %p2593_p5, %p2592_p3 }
  0x40   : > { %p2590_p0 = pneg %p2589_p13 }
  0x42   : > { %p2595_p12 = pnand %p2594_p1, %p2590_p0 }
  0x44   : > { %2598 = shalt.err (!%p2595_p12)
}
  0x45   : > { %s2599_s16 = scalar_lea.vmem %s440_s20, 64  ;;  %s2803_s11 = smov [#allocation5]  }
  0x46   : > { %p2600_p6 = scmp.ne.s32.totalorder %s440_s20, %s2599_s16  ;;  %s2604_s9 = sshll.u32 %s2803_s11, 4  ;;  %s2605_s9 = int_to_ptr.vmem [resolvable:$false] %s2604_s9 }
  0x47   : > { %s2606_s10 = scalar_lea.vmem %s2605_s9, 128  ;;  %p2607_p2 = scmp.lt.s32.totalorder %s440_s20, %s2605_s9 }
  0x48   : > { %p2602_p7 = pnand %p2600_p6, %p2996_p10  ;;  %p2608_p13 = scmp.lt.s32.totalorder %s2606_s10, %s2599_s16 }
  0x4a   : > { %p2603_p4 = pneg %p2602_p7  ;;  %p2609_p8 = por %p2608_p13, %p2607_p2 }
  0x4c   : > { %p2610_p11 = pnand %p2609_p8, %p2603_p4 }
  0x4e   : > { %2613 = shalt.err (!%p2610_p11)
}
  0x4f   : > { %2462 = dma.hbm_to_vmem [thread:$0]  (!%p2978_p9), %s2987_s30, 64, %s440_s20, %s2990_s28  }
  0x50   : > { %s2804_s6 = smov [#allocation10]   ;;  %s2805_s15 = smov [#allocation11]  }
  0x51   : > { %s367_s24 = sshll.u32 %s2804_s6, 4  ;;  %s380_s17 = sshll.u32 %s2805_s15, 4  ;;  %s368_s24 = int_to_ptr.vmem [resolvable:$true] %s367_s24  ;;  %s381_s17 = int_to_ptr.vmem [resolvable:$true] %s380_s17 }
  0x52   : > { %s2625_s26 = scalar_lea.vmem %s368_s24, 256  ;;  %p3490_p6 = scmp.ne.s32.totalorder %s3481_s14, 0 }
  0x53   : > { %p2626_p1 = scmp.ne.s32.totalorder %s368_s24, %s2625_s26  ;;  %p2633_p3 = scmp.lt.s32.totalorder %s368_s24, %s368_s24 }
  0x54   : > { %p3491_p12 = pneg %p3490_p6  ;;  %p2634_p4 = scmp.lt.s32.totalorder %s2625_s26, %s2625_s26 }
  0x56   : > { %p2628_p7 = pnand %p2626_p1, %p3491_p12  ;;  %p2635_p8 = por %p2634_p4, %p2633_p3 }
  0x58   : > { %p2629_p0 = pneg %p2628_p7 }
  0x5a   : > { %p2636_p11 = pnand %p2635_p8, %p2629_p0 }
  0x5c   : > { %2639 = shalt.err (!%p2636_p11)
}
  0x5d   : > { %s3492_s9 = smov 4   ;;  %s3493_s10 = smov 64  }
  0x5e   : > { %2452 = dma.hbm_to_vmem [thread:$0]  (!%p3490_p6), %s3441_s7, 256, %s368_s24, [#allocation9], %s3493_s10, %s3493_s10, %s3492_s9  }
  0x5f   : > { %s2651_s30 = scalar_lea.vmem %s381_s17, 256  ;;  %p3494_p2 = pmov %p3491_p12 }
  0x60   : > { %p2652_p5 = scmp.ne.s32.totalorder %s381_s17, %s2651_s30  ;;  %p2659_p12 = scmp.lt.s32.totalorder %s381_s17, %s381_s17 }
  0x61   : > { %p2660_p7 = scmp.lt.s32.totalorder %s2651_s30, %s2651_s30 }
  0x62   : > { %p2654_p13 = pnand %p2652_p5, %p3494_p2 }
  0x63   : > { %p2661_p0 = por %p2660_p7, %p2659_p12 }
  0x64   : > { %p2655_p1 = pneg %p2654_p13 }
  0x66   : > { %p2662_p3 = pnand %p2661_p0, %p2655_p1 }
  0x68   : > { %2665 = shalt.err (!%p2662_p3)
}
  0x69   : > { %2455 = dma.hbm_to_vmem [thread:$0]  (!%p3490_p6), %s3442_s8, 256, %s381_s17, [#allocation12], %s3493_s10, %s3493_s10, %s3492_s9  }
  0x6a   : > { %s3041_s15 = scalar_lea.hbm %s3435_s1, %s2972_s21  ;;  %s414_s14 = scalar_lea.vmem [#allocation2], %s2976_s12 }
  0x6b   : > { %s421_s26 = sshll.u32 %s414_s14, 4  ;;  %s3048_s30 = scalar_lea.hbm %s3437_s3, %s2972_s21  ;;  %s422_s26 = int_to_ptr.vmem [resolvable:$true] %s421_s26 }
  0x6c   : > { %s3495_s19 = sand.u32 1, %s2794_s23   ;;  %s2666_s2 = scalar_lea.hbm %s3041_s15, 64 }
  0x6d   : > { %s411_s16 = scalar_lea.sflag [#allocation3], %s3495_s19  ;;  %p2667_p6 = scmp.ne.s32.totalorder %s3041_s15, %s2666_s2 }
  0x6e   : > { %s2671_s10 = scalar_lea.hbm %s3435_s1, 128  ;;  %p2672_p11 = scmp.lt.s32.totalorder %s3041_s15, %s3435_s1 }
  0x6f   : > { %p2669_p4 = pnand %p2667_p6, %p2996_p10  ;;  %p2673_p5 = scmp.lt.s32.totalorder %s2671_s10, %s2666_s2 }
  0x71   : > { %p2670_p8 = pneg %p2669_p4  ;;  %p2674_p2 = por %p2673_p5, %p2672_p11 }
  0x73   : > { %p2675_p13 = pnand %p2674_p2, %p2670_p8 }
  0x75   : > { %2678 = shalt.err (!%p2675_p13)
}
  0x76   : > { %s2679_s21 = scalar_lea.vmem %s422_s26, 64  ;;  %s2806_s14 = smov [#allocation2]  }
  0x77   : > { %p2680_p1 = scmp.ne.s32.totalorder %s422_s26, %s2679_s21  ;;  %s2684_s11 = sshll.u32 %s2806_s14, 4  ;;  %s2685_s11 = int_to_ptr.vmem [resolvable:$false] %s2684_s11 }
  0x78   : > { %s2686_s20 = scalar_lea.vmem %s2685_s11, 128  ;;  %p2687_p0 = scmp.lt.s32.totalorder %s422_s26, %s2685_s11 }
  0x79   : > { %p2682_p12 = pnand %p2680_p1, %p2996_p10  ;;  %p2688_p3 = scmp.lt.s32.totalorder %s2686_s20, %s2679_s21 }
  0x7b   : > { %p2683_p7 = pneg %p2682_p12  ;;  %p2689_p6 = por %p2688_p3, %p2687_p0 }
  0x7d   : > { %p2690_p4 = pnand %p2689_p6, %p2683_p7 }
  0x7f   : > { %2693 = shalt.err (!%p2690_p4)
}
  0x80   : > { %2459 = dma.hbm_to_vmem [thread:$0]  (!%p2978_p9), %s3041_s15, 64, %s422_s26, %s411_s16  }
  0x81   : > { %s450_s2 = scalar_lea.vmem [#allocation7], %s2976_s12  ;;  %s2694_s17 = scalar_lea.hbm %s3048_s30, 64 }
  0x82   : > { %s457_s19 = sshll.u32 %s450_s2, 4  ;;  %p2695_p8 = scmp.ne.s32.totalorder %s3048_s30, %s2694_s17  ;;  %s458_s19 = int_to_ptr.vmem [resolvable:$true] %s457_s19 }
  0x83   : > { %s2699_s6 = scalar_lea.hbm %s3437_s3, 128  ;;  %p2700_p2 = scmp.lt.s32.totalorder %s3048_s30, %s3437_s3 }
  0x84   : > { %p2697_p11 = pnand %p2695_p8, %p2996_p10  ;;  %p2701_p13 = scmp.lt.s32.totalorder %s2699_s6, %s2694_s17 }
  0x86   : > { %p2698_p5 = pneg %p2697_p11  ;;  %p2702_p1 = por %p2701_p13, %p2700_p2 }
  0x88   : > { %p2703_p12 = pnand %p2702_p1, %p2698_p5 }
  0x8a   : > { %2706 = shalt.err (!%p2703_p12)
}
  0x8b   : > { %s2707_s12 = scalar_lea.vmem %s458_s19, 64  ;;  %s2807_s15 = smov [#allocation7]  }
  0x8c   : > { %p2708_p7 = scmp.ne.s32.totalorder %s458_s19, %s2707_s12  ;;  %s2712_s26 = sshll.u32 %s2807_s15, 4  ;;  %s2713_s26 = int_to_ptr.vmem [resolvable:$false] %s2712_s26 }
  0x8d   : > { %s2714_s16 = scalar_lea.vmem %s2713_s26, 128  ;;  %p2715_p6 = scmp.lt.s32.totalorder %s458_s19, %s2713_s26 }
  0x8e   : > { %p2710_p0 = pnand %p2708_p7, %p2996_p10  ;;  %p2716_p4 = scmp.lt.s32.totalorder %s2714_s16, %s2707_s12 }
  0x90   : > { %p2711_p3 = pneg %p2710_p0  ;;  %p2717_p8 = por %p2716_p4, %p2715_p6 }
  0x92   : > { %p2718_p11 = pnand %p2717_p8, %p2711_p3 }
  0x94   : > { %2721 = shalt.err (!%p2718_p11)
}
  0x95   : > { %2465 = dma.hbm_to_vmem [thread:$0]  (!%p2978_p9), %s3048_s30, 64, %s458_s19, %s2990_s28  }
  0x96   : > { %p3496_p5 = scmp.ne.s32.totalorder %s3480_s29, 0 }
  0x97   : > { %s3089_s18 = sand.u32 (!%p3496_p5), 1, %s2790_s22   ;;  %p3497_p10 = scmp.ne.s32.totalorder (!%p3496_p5), %s3477_s27, 0 }
  0x98   : > { %466 = sbr.rel (%p3496_p5) target bundleno = 2637 (0xa4d), region = 68  ;;  %s3092_s14 = sshll.u32 (!%p3496_p5), %s3089_s18, 2 }
  0x99   : > { %s469_s11 = scalar_lea.sflag (!%p3496_p5), [#allocation3], %s3089_s18  ;;  %s472_s20 = scalar_lea.vmem (!%p3496_p5), [#allocation2], %s3092_s14 }
  0x9d   : > { %2765 = dma.done.wait (%p3497_p10), %s469_s11, 64  }
  0x9e   : > { %2767 = vsyncadd (%p3497_p10), %s469_s11, 4294967232  ;;  %s477_s28 = sand.u32 1, %s2906_s25   ;;  %s481_s13 = scalar_lea.vmem [#allocation5], %s3092_s14 }
  0x9f   : > { %s478_s29 = scalar_lea.sflag [#allocation6], %s477_s28 }
  0xa0   : > { %2769 = dma.done.wait (%p3497_p10), %s478_s29, 128  }
  0xa1   : > { %2771 = vsyncadd (%p3497_p10), %s478_s29, 4294967168  ;;  %s490_s30 = scalar_lea.vmem [#allocation7], %s3092_s14  ;;  %p3498_p9 = scmp.eq.s32.totalorder %s2906_s25, 0 }
  0xa3   : > { %2773 = dma.done.wait (%p3498_p9), [#allocation9], 512   ;;  %p3499_p2 = pmov %p3498_p9 }
  0xa5   : > { %2775 = vsyncadd (%p3499_p2), [#allocation9], 4294966784  ;;  %p3500_p13 = pmov %p3499_p2 }
  0xa6   : > { %p3501_p1 = pmov %p3499_p2 }
  0xa7   : > { %2777 = dma.done.wait (%p3500_p13), [#allocation12], 256  }
  0xa8   : > { %2779 = vsyncadd (%p3501_p1), [#allocation12], 4294967040  ;;  %p557_p12 = scmp.lt.s32.totalorder %s2906_s25, 1  ;;  %vm574_vm0 = vcmask 261120   ;;  %v2526_v2 = vld [vmem:[%s3439_s5 + $0x8] sm:$0xff]   ;;  %v2808_v3 = vmov 0.0   ;;  %v804_v32 = vlaneseq }
  0xa9   : > { %2334 = vmatprep.subr.bf16.mxu1 %v2808_v3  ;;  %vm2809_vm1 = vmmov 0   ;;  %v2527_v4 = vld [vmem:[%s3439_s5] sm:$0xff]   ;;  %2326 = vmatprep.subr.bf16.mxu0 %v2808_v3  ;;  %v2528_v11 = vld [vmem:[%s3438_s4 + $0x8] sm:$0xff]   ;;  %s3502_s28 = sld [smem:[#allocation28_spill]]  ;;  %s2810_s29 = smov 120   ;;  %vm1235_vm2 = vcmask 64512  }
  0xaa   : > { %s558_s2 = scalar_select %p557_p12, %s2906_s25, 1  ;;  %2338 = vmatprep.mubr.msk.bf16.mxu1 %vm2809_vm1, %v2808_v3  ;;  %2335 = vmatpush3.bf16.msra.mxu1 %v2526_v2  ;;  %v563_v5 = vld [vmem:[%s472_s20] sm:$0xf]  ;;  %v2813_v30 = vmov 1983009808   ;;  %v805_v34 = vshrl.u32 %v804_v32, 7 }
  0xab   : > { %2336 = vmatprep.subr.bf16.mxu1 %v2808_v3  ;;  %2330 = vmatprep.mubr.msk.bf16.mxu0 %vm2809_vm1, %v2808_v3  ;;  %v2529_v12 = vld [vmem:[%s3438_s4] sm:$0xff]   ;;  %v802_v31 = vunpack.c.l.s4 %v2813_v30  ;;  %v2814_v38 = vmov 1934713408   ;;  %vm1471_vm3 = vcmask 1043456   ;;  %s2816_s24 = smov 16   ;;  %s2817_s21 = smov 8  }
  0xac   : > { %s2233_s27 = sshll.u32 %s558_s2, 3  ;;  %2327 = vmatpush3.bf16.msra.mxu0 %v2528_v11  ;;  %s2811_s2 = smov 104   ;;  %v834_v39 = vunpack.c.l.s4 %v2814_v38  ;;  %vm1802_vm4 = vcmask 130048   ;;  %vm1804_vm5 = vcmask 195584   ;;  %vm1999_vm6 = vcmask 523264  }
  0xad   : > { %s560_s9 = scalar_lea.vmem %s3434_s0, %s2233_s27  ;;  %2328 = vmatprep.subr.bf16.mxu0 %v2808_v3  ;;  %s2812_s27 = smov 112   ;;  %v803_v33 = vunpack.c.0.s8 %v802_v31 }
  0xae   : > { %v3120_v0 = vld [vmem:[%s560_s9] sm:$0xff]  ;;  %2337 = vmatpush3.bf16.msra.mxu1 %v2527_v4  ;;  %v835_v44 = vunpack.c.0.s8 %v834_v39  ;;  %s2818_s12 = smov 24   ;;  %s3503_s20 = sld [smem:[#allocation27_spill]] }
  0xaf   : > { %v575_v1 = vsel %vm574_vm0, %v3120_v0, 0.0  ;;  %2350 = vmatprep.subr.bf16.mxu1 %v2808_v3  ;;  %v2240_v13 = vld [vmem:[%s3502_s28 + $0x1] ss:$0 sm:$0xff]  ;;  %v2234_v23 = vld [vmem:[%s3502_s28 + $0x5] ss:$0 sm:$0xff]  ;;  %v3168_v37 = vsub.s32 %v803_v33, %v805_v34  ;;  %s3505_s16 = sld [smem:[#allocation24_spill]] }
  0xb0   : > { %576 = vadd.xlane.f32.xlu0 %v575_v1  ;;  %2329 = vmatpush3.bf16.msra.mxu0 %v2529_v12  ;;  %v2235_v25 = vld [vmem:[%s3502_s28 + $0x6] ss:$0 sm:$0xff]  ;;  %v3174_v49 = vsub.s32 %v835_v44, %v805_v34  ;;  %s2287_s11 = sshll.u32 %s2906_s25, 7  ;;  %s3506_s17 = sld [smem:[#allocation30_spill]] }
  0xb1   : > { %2339 = vmatmul.mubr.msk.bf16.vlgmr.msra.gmra.mxu1 %vm574_vm0, %v563_v5  ;;  %2342 = vmatprep.subr.bf16.mxu0 %v2808_v3  ;;  %s2046_s25 = scalar_lea.sflag [#allocation4], %s3089_s18 }
  0xb2   : > { %2352 = vmatprep.mubr.msk.bf16.mxu1 %vm2809_vm1, %v2808_v3 }
  0xb5   : > { %p3507_p0 = scmp.ne.s32.totalorder %s3505_s16, 0 }
  0xb6   : > { %s3390_s9 = scalar_lea.hbm %s3506_s17, %s2287_s11 }
 0x139   : > { %v577_v6 = vpop.xlane.xlu0 %576 }
 0x13a   : > { %v579_v7 = vmul.f32 0.03125, %v577_v6 }
 0x13c   : > { %v580_v8 = vsub.f32 %v3120_v0, %v579_v7 }
 0x13e   : > { %v581_v9 = vmul.f32 %v580_v8, %v580_v8 }
 0x140   : > { %v582_v10 = vsel %vm574_vm0, %v581_v9, 0.0 }
 0x141   : > { %583 = vadd.xlane.f32.xlu0 %v582_v10 }
 0x171   : > { %v720_v14 = vpop.f32.mrf.mxu1 }
 0x172   : > { %v721_v15 = vadd.f32 %v2240_v13, %v720_v14  ;;  %v2531_v13 = vld [vmem:[#allocation8] sm:$0xff]  }
 0x173   : > { %v2340_v16 = vpop.f32.mrf.mxu1 }
 0x174   : > { %938 = vrot.lane.b32.xlu1 %v721_v15, %s2810_s29  ;;  %944 = vrot.lane.b32.xlu0 %v721_v15, %s2811_s2 }
 0x175   : > { %v723_v17 = vpop.f32.mrf.mxu1 }
 0x176   : > { %v564_v17 = vld [vmem:[%s481_s13] sm:$0xf]  ;;  %s2819_s13 = smov [#allocation13]  }
 0x177   : > { %v2341_v18 = vpop.f32.mrf.mxu1  ;;  %s2726_s6 = sshll.u32 %s2819_s13, 4  ;;  %s2727_s6 = int_to_ptr.vmem [resolvable:$false] %s2726_s6 }
 0x178   : > { %941 = vrot.lane.b32.xlu1 %v721_v15, %s2812_s27  ;;  %s2728_s14 = scalar_lea.vmem %s2727_s6, 256 }
 0x1ca   : > { %v584_v19 = vpop.xlane.xlu0 %583 }
 0x1cb   : > { %v585_v20 = vmul.f32 0.03125, %v584_v19 }
 0x1cd   : > { %v586_v21 = vadd.f32 1e-05, %v585_v20  ;;  %v2815_v20 = vmov 0  }
 0x1cf   : > { %2540 = vrsqrt.f32 %v586_v21 }
 0x1dc   : > { %v2541_v22 = vpop.eup %2540 }
 0x1dd   : > { %v588_v24 = vmul.f32 %v2541_v22, %v580_v8  ;;  %v2530_v8 = vld [vmem:[#allocation8 + $0x8] sm:$0xff]  }
 0x1df   : > { %v593_v26 = vmul.f32 %v2234_v23, %v588_v24 }
 0x1e1   : > { %v598_v27 = vadd.f32 %v2235_v25, %v593_v26 }
 0x1e3   : > { %v599_v28 = vpack.c.bf16 %v598_v27, %v598_v27 }
 0x1e5   : > { %2331 = vmatmul.mubr.msk.bf16.vlgmr.msra.gmra.mxu0 %vm574_vm0, %v599_v28  ;;  %v2236_v28 = vld [vmem:[%s3502_s28] ss:$0 sm:$0xff] }
 0x1e6   : > { %2346 = vmatprep.mubr.msk.bf16.mxu0 %vm2809_vm1, %v2808_v3  ;;  %v939_v29 = vpop.permute.xlu1 %938  ;;  %v945_v36 = vpop.permute.xlu0 %944  ;;  %2343 = vmatpush3.bf16.msra.mxu0 %v2530_v8 }
 0x1e7   : > { %v963_v42 = vcombine.low %v939_v29, %v945_v36  ;;  %v964_v43 = vcombine.high %v939_v29, %v945_v36  ;;  %2344 = vmatprep.subr.bf16.mxu0 %v2808_v3 }
 0x1e9   : > { %v971_v47 = vrot.slane %v963_v42, %v3168_v37  ;;  %v978_v48 = vrot.slane %v964_v43, %v3168_v37 }
 0x1ea   : > { %v942_v35 = vpop.permute.xlu1 %941  ;;  %2345 = vmatpush3.bf16.msra.mxu0 %v2531_v13 }
 0x1eb   : > { %v947_v40 = vcombine.low %v721_v15, %v942_v35  ;;  %v948_v41 = vcombine.high %v721_v15, %v942_v35  ;;  %2356 = vmatprep.subr.bf16.mxu0 %v2808_v3 }
 0x1ed   : > { %v955_v45 = vrot.slane %v947_v40, %v3168_v37  ;;  %v962_v46 = vrot.slane %v948_v41, %v3168_v37  ;;  %2347 = vmatmul.mubr.msk.bf16.vlgmr.msra.gmra.mxu0 %vm574_vm0, %v564_v17 }
 0x1ee   : > { %2358 = vmatprep.mubr.msk.bf16.mxu0 %vm2809_vm1, %v2808_v3 }
 0x1ef   : > { %v979_v50 = vcombine.low %v955_v45, %v971_v47  ;;  %v980_v51 = vcombine.high %v955_v45, %v971_v47  ;;  %v995_v52 = vcombine.low %v962_v46, %v978_v48  ;;  %v996_v53 = vcombine.high %v962_v46, %v978_v48 }
 0x1f1   : > { %v987_v54 = vrot.slane %v979_v50, %v3174_v49  ;;  %v994_v55 = vrot.slane %v980_v51, %v3174_v49  ;;  %v1003_v56 = vrot.slane %v995_v52, %v3174_v49  ;;  %v1010_v57 = vrot.slane %v996_v53, %v3174_v49 }
 0x1f3   : > { %v1011_v58 = vcombine.high %v987_v54, %v2808_v3  ;;  %v1012_v59 = vcombine.high %v994_v55, %v2808_v3  ;;  %v1013_v60 = vcombine.high %v1003_v56, %v2808_v3  ;;  %v1014_v61 = vcombine.high %v1010_v57, %v2808_v3 }
 0x1f4   : > { %v2252_v62 = vpack.c.bf16 %v1003_v56, %v987_v54  ;;  %v2253_v63 = vpack.c.bf16 %v1010_v57, %v994_v55 }
 0x1f5   : > { %v2254_v1 = vpack.c.bf16 %v1013_v60, %v1011_v58  ;;  %v2255_v2 = vpack.c.bf16 %v1014_v61, %v1012_v59 }
 0x1f6   : > { %v1030_v4 = vrot.slane %v2252_v62, %v3168_v37  ;;  %v1038_v5 = vrot.slane %v2253_v63, %v3168_v37 }
 0x1f7   : > { %v1055_v6 = vrot.slane %v2254_v1, %v3168_v37  ;;  %v1063_v7 = vrot.slane %v2255_v2, %v3168_v37 }
 0x1f8   : > { %v1039_v9 = vcombine.low %v1030_v4, %v1038_v5 }
 0x1f9   : > { %v1064_v10 = vcombine.low %v1055_v6, %v1063_v7 }
 0x1fa   : > { %v1046_v11 = vrot.slane %v1039_v9, %v3174_v49 }
 0x1fb   : > { %v1071_v12 = vrot.slane %v1064_v10, %v3174_v49 }
 0x1fc   : > { %v1076_v15 = vshrl.u32 %v1046_v11, 16  ;;  %v3196_v21 = vcombine.high %v1046_v11, %v2815_v20 }
 0x1fd   : > { %v1075_v14 = vpack.i.b16 %v1071_v12, %v1046_v11  ;;  %v1077_v16 = vshrl.u32 %v1071_v12, 16  ;;  %v3199_v22 = vcombine.high %v1071_v12, %v2815_v20 }
 0x1fe   : > { %v1082_v25 = vshrl.u32 %v3196_v21, 16 }
 0x1ff   : > { %v1240_v18 = vsel %vm1235_vm2, %v1075_v14, 0  ;;  %v1078_v19 = vpack.i.b16 %v1077_v16, %v1076_v15  ;;  %v1081_v24 = vpack.i.b16 %v3199_v22, %v3196_v21  ;;  %v1083_v26 = vshrl.u32 %v3199_v22, 16 }
 0x200   : > { %2351 = vmatpush3.bf16.xpose.msra.mxu1 %v1240_v18 }
 0x201   : > { %v1286_v23 = vsel %vm1235_vm2, %v1078_v19, 0  ;;  %2362 = vmatprep.subr.bf16.mxu1 %v2808_v3  ;;  %v1084_v27 = vpack.i.b16 %v1083_v26, %v1082_v25  ;;  %v1332_v16 = vsel %vm1235_vm2, %v1081_v24, 0  ;;  %v1233_v26 = vld [vmem:[%s490_s30] sm:$0xf] }
 0x202   : > { %2357 = vmatpush3.bf16.xpose.msra.mxu0 %v1286_v23 }
 0x203   : > { %2368 = vmatprep.subr.bf16.mxu0 %v2808_v3  ;;  %v1378_v19 = vsel %vm1235_vm2, %v1084_v27, 0  ;;  %v1234_v27 = vunpack.c.l.bf16 %v1233_v26 }
 0x2a5   : > { %v657_v29 = vpop.f32.mrf.mxu0 }
 0x2a6   : > { %v658_v30 = vadd.f32 %v2236_v28, %v657_v29 }
 0x2a7   : > { %v2332_v31 = vpop.f32.mrf.mxu0 }
 0x2a8   : > { %790 = vrot.lane.b32.xlu1 %v658_v30, %s2810_s29 }
 0x2a9   : > { %v660_v32 = vpop.f32.mrf.mxu0 }
 0x2ab   : > { %v2333_v33 = vpop.f32.mrf.mxu0 }
 0x2ac   : > { %793 = vrot.lane.b32.xlu1 %v658_v30, %s2812_s27 }
 0x2ad   : > { %v3217_v34 = vpop.f32.mrf.mxu0 }
 0x2af   : > { %v2348_v35 = vpop.f32.mrf.mxu0 }
 0x2b0   : > { %796 = vrot.lane.b32.xlu1 %v658_v30, %s2811_s2 }
 0x2b1   : > { %v786_v36 = vpop.f32.mrf.mxu0 }
 0x2b3   : > { %v2349_v38 = vpop.f32.mrf.mxu0 }
 0x31a   : > { %v791_v39 = vpop.permute.xlu1 %790 }
 0x31e   : > { %v794_v40 = vpop.permute.xlu1 %793 }
 0x31f   : > { %v799_v41 = vcombine.low %v658_v30, %v794_v40  ;;  %v800_v42 = vcombine.high %v658_v30, %v794_v40 }
 0x321   : > { %v807_v46 = vrot.slane %v799_v41, %v3168_v37  ;;  %v814_v47 = vrot.slane %v800_v42, %v3168_v37 }
 0x322   : > { %v797_v43 = vpop.permute.xlu1 %796 }
 0x323   : > { %v815_v44 = vcombine.low %v791_v39, %v797_v43  ;;  %v816_v45 = vcombine.high %v791_v39, %v797_v43 }
 0x325   : > { %v823_v48 = vrot.slane %v815_v44, %v3168_v37  ;;  %v830_v50 = vrot.slane %v816_v45, %v3168_v37 }
 0x327   : > { %v831_v51 = vcombine.low %v807_v46, %v823_v48  ;;  %v832_v52 = vcombine.high %v807_v46, %v823_v48  ;;  %v847_v53 = vcombine.low %v814_v47, %v830_v50  ;;  %v848_v54 = vcombine.high %v814_v47, %v830_v50 }
 0x329   : > { %v839_v55 = vrot.slane %v831_v51, %v3174_v49  ;;  %v846_v56 = vrot.slane %v832_v52, %v3174_v49  ;;  %v855_v57 = vrot.slane %v847_v53, %v3174_v49  ;;  %v862_v58 = vrot.slane %v848_v54, %v3174_v49 }
 0x32b   : > { %v863_v59 = vcombine.high %v839_v55, %v2808_v3  ;;  %v864_v60 = vcombine.high %v846_v56, %v2808_v3  ;;  %v865_v61 = vcombine.high %v855_v57, %v2808_v3  ;;  %v866_v62 = vcombine.high %v862_v58, %v2808_v3 }
 0x32c   : > { %v2248_v63 = vpack.c.bf16 %v855_v57, %v839_v55  ;;  %v2249_v1 = vpack.c.bf16 %v862_v58, %v846_v56  ;;  %v2244_v55 = vld [vmem:[%s3502_s28 + $0x2] ss:$0 sm:$0xff] }
 0x32d   : > { %v2250_v2 = vpack.c.bf16 %v865_v61, %v863_v59  ;;  %v2251_v4 = vpack.c.bf16 %v866_v62, %v864_v60  ;;  %v784_v56 = vadd.f32 %v2244_v55, %v3217_v34 }
 0x32e   : > { %v882_v5 = vrot.slane %v2248_v63, %v3168_v37  ;;  %v890_v6 = vrot.slane %v2249_v1, %v3168_v37 }
 0x32f   : > { %v907_v7 = vrot.slane %v2250_v2, %v3168_v37  ;;  %v915_v8 = vrot.slane %v2251_v4, %v3168_v37 }
 0x330   : > { %v891_v9 = vcombine.low %v882_v5, %v890_v6 }
 0x331   : > { %v916_v10 = vcombine.low %v907_v7, %v915_v8 }
 0x332   : > { %v898_v11 = vrot.slane %v891_v9, %v3174_v49 }
 0x333   : > { %v923_v12 = vrot.slane %v916_v10, %v3174_v49 }
 0x334   : > { %v928_v14 = vshrl.u32 %v898_v11, 16  ;;  %v899_v21 = vcombine.high %v898_v11, %v2815_v20 }
 0x335   : > { %v927_v13 = vpack.i.b16 %v923_v12, %v898_v11  ;;  %v929_v15 = vshrl.u32 %v923_v12, 16  ;;  %v924_v18 = vcombine.high %v923_v12, %v2815_v20 }
 0x336   : > { %v934_v24 = vshrl.u32 %v899_v21, 16 }
 0x337   : > { %2353 = vmatmul.mubr.msk.bf16.vlgmr.msra.gmra.mxu1 %vm1235_vm2, %v927_v13  ;;  %v930_v17 = vpack.i.b16 %v929_v15, %v928_v14  ;;  %v935_v22 = vshrl.u32 %v924_v18, 16  ;;  %v933_v23 = vpack.i.b16 %v924_v18, %v899_v21 }
 0x338   : > { %2363 = vmatpush3.bf16.xpose.msra.mxu1 %v1332_v16  ;;  %2364 = vmatprep.mubr.msk.bf16.mxu1 %vm2809_vm1, %v2808_v3 }
 0x339   : > { %2359 = vmatmul.mubr.msk.bf16.vlgmr.msra.gmra.mxu0 %vm1235_vm2, %v930_v17  ;;  %2374 = vmatprep.subr.bf16.mxu1 %v2808_v3  ;;  %v936_v25 = vpack.i.b16 %v935_v22, %v934_v24 }
 0x33a   : > { %2369 = vmatpush3.bf16.xpose.msra.mxu0 %v1378_v19  ;;  %2370 = vmatprep.mubr.msk.bf16.mxu0 %vm2809_vm1, %v2808_v3 }
 0x33b   : > { %2380 = vmatprep.subr.bf16.mxu0 %v2808_v3 }
 0x33f   : > { %2365 = vmatmul.mubr.msk.bf16.vlgmr.msra.gmra.mxu1 %vm1235_vm2, %v933_v23 }
 0x340   : > { %2376 = vmatprep.mubr.msk.bf16.mxu1 %vm2809_vm1, %v2808_v3 }
 0x341   : > { %2371 = vmatmul.mubr.msk.bf16.vlgmr.msra.gmra.mxu0 %vm1235_vm2, %v936_v25 }
 0x342   : > { %2382 = vmatprep.mubr.msk.bf16.mxu0 %vm2809_vm1, %v2808_v3 }
 0x3f7   : > { %v1276_v28 = vpop.f32.mrf.mxu1 }
 0x3f8   : > { %v1277_v29 = vadd.f32 %v1276_v28, %v1234_v27 }
 0x3f9   : > { %v2354_v30 = vpop.f32.mrf.mxu1  ;;  %v1322_v31 = vpop.f32.mrf.mxu0 }
 0x3fa   : > { %v1323_v32 = vadd.f32 %v1322_v31, %v1234_v27  ;;  %v1420_v33 = vsel %vm1235_vm2, %v1277_v29, -inf }
 0x3fb   : > { %v2360_v35 = vpop.f32.mrf.mxu0  ;;  %1421 = vmax.xlane.f32.xlu1 %v1420_v33  ;;  %v1279_v36 = vpop.f32.mrf.mxu1 }
 0x3fc   : > { %v1423_v38 = vsel %vm1235_vm2, %v1323_v32, -inf }
 0x3fd   : > { %1424 = vmax.xlane.f32.xlu0 %v1423_v38  ;;  %v2355_v39 = vpop.f32.mrf.mxu1  ;;  %v1325_v40 = vpop.f32.mrf.mxu0 }
 0x3ff   : > { %v2361_v41 = vpop.f32.mrf.mxu0  ;;  %v1368_v42 = vpop.f32.mrf.mxu1 }
 0x400   : > { %v1369_v43 = vadd.f32 %v1368_v42, %v1234_v27 }
 0x401   : > { %v2366_v44 = vpop.f32.mrf.mxu1  ;;  %v1414_v45 = vpop.f32.mrf.mxu0 }
 0x402   : > { %v1415_v46 = vadd.f32 %v1414_v45, %v1234_v27  ;;  %v1426_v47 = vsel %vm1235_vm2, %v1369_v43, -inf }
 0x403   : > { %v2372_v48 = vpop.f32.mrf.mxu0  ;;  %1427 = vmax.xlane.f32.xlu1 %v1426_v47  ;;  %v1371_v50 = vpop.f32.mrf.mxu1 }
 0x404   : > { %v1429_v53 = vsel %vm1235_vm2, %v1415_v46, -inf }
 0x405   : > { %v2367_v51 = vpop.f32.mrf.mxu1  ;;  %v1417_v52 = vpop.f32.mrf.mxu0 }
 0x407   : > { %v2373_v54 = vpop.f32.mrf.mxu0  ;;  %1430 = vmax.xlane.f32.xlu1 %v1429_v53 }
 0x418   : > { %1089 = vrot.lane.b32.xlu1 %v784_v56, %s2812_s27 }
 0x484   : > { %v1422_v57 = vpop.xlane.xlu1 %1421 }
 0x485   : > { %v1432_v58 = vsub.f32 %v1277_v29, %v1422_v57 }
 0x486   : > { %v1425_v59 = vpop.xlane.xlu0 %1424 }
 0x487   : > { %v1436_v60 = vmul.f32 1.442695, %v1432_v58  ;;  %v1433_v61 = vsub.f32 %v1323_v32, %v1425_v59 }
 0x489   : > { %2542 = vpow2.f32 %v1436_v60  ;;  %v1438_v62 = vmul.f32 1.442695, %v1433_v61 }
 0x48b   : > { %2544 = vpow2.f32 %v1438_v62 }
 0x48c   : > { %v1428_v4 = vpop.xlane.xlu1 %1427 }
 0x48d   : > { %v1434_v6 = vsub.f32 %v1369_v43, %v1428_v4 }
 0x48f   : > { %v1440_v8 = vmul.f32 1.442695, %v1434_v6 }
 0x490   : > { %v1431_v5 = vpop.xlane.xlu1 %1430 }
 0x491   : > { %v1435_v7 = vsub.f32 %v1415_v46, %v1431_v5  ;;  %2546 = vpow2.f32 %v1440_v8 }
 0x493   : > { %v1442_v9 = vmul.f32 1.442695, %v1435_v7 }
 0x494   : > { %v1090_v14 = vpop.permute.xlu1 %1089 }
 0x495   : > { %2548 = vpow2.f32 %v1442_v9  ;;  %v1095_v17 = vcombine.low %v784_v56, %v1090_v14  ;;  %v1096_v18 = vcombine.high %v784_v56, %v1090_v14 }
 0x496   : > { %v3266_v63 = vpop.eup %2542 }
 0x497   : > { %v1444_v1 = vsel %vm1235_vm2, %v3266_v63, 0.0  ;;  %v1103_v24 = vrot.slane %v1095_v17, %v3168_v37  ;;  %v1110_v25 = vrot.slane %v1096_v18, %v3168_v37 }
 0x498   : > { %v3270_v2 = vpop.eup %2544  ;;  %1445 = vadd.xlane.f32.xlu0 %v1444_v1 }
 0x499   : > { %v1447_v34 = vsel %vm1235_vm2, %v3270_v2, 0.0 }
 0x49a   : > { %1448 = vadd.xlane.f32.xlu1 %v1447_v34 }
 0x49e   : > { %v3276_v10 = vpop.eup %2546 }
 0x49f   : > { %v1450_v12 = vsel %vm1235_vm2, %v3276_v10, 0.0 }
 0x4a2   : > { %v3278_v11 = vpop.eup %2548 }
 0x4a3   : > { %v1453_v13 = vsel %vm1235_vm2, %v3278_v11, 0.0 }
 0x4ab   : > { %1092 = vrot.lane.b32.xlu1 %v784_v56, %s2811_s2 }
 0x4ae   : > { %1086 = vrot.lane.b32.xlu0 %v784_v56, %s2810_s29 }
 0x4cd   : > { %1451 = vadd.xlane.f32.xlu0 %v1450_v12 }
 0x4cf   : > { %1454 = vadd.xlane.f32.xlu1 %v1453_v13 }
 0x521   : > { %v1446_v15 = vpop.xlane.xlu0 %1445 }
 0x522   : > { %2550 = vrcp.f32 %v1446_v15 }
 0x523   : > { %v1449_v16 = vpop.xlane.xlu1 %1448 }
 0x524   : > { %2552 = vrcp.f32 %v1449_v16 }
 0x525   : > { %v1087_v19 = vpop.permute.xlu0 %1086 }
 0x527   : > { %v1093_v21 = vpop.permute.xlu1 %1092 }
 0x528   : > { %v1111_v22 = vcombine.low %v1087_v19, %v1093_v21  ;;  %v1112_v23 = vcombine.high %v1087_v19, %v1093_v21 }
 0x52a   : > { %v1119_v26 = vrot.slane %v1111_v22, %v3168_v37  ;;  %v1126_v27 = vrot.slane %v1112_v23, %v3168_v37  ;;  %v2532_v22 = vld [vmem:[#allocation10 + $0x8] sm:$0xff]  }
 0x52c   : > { %v1127_v28 = vcombine.low %v1103_v24, %v1119_v26  ;;  %v1128_v29 = vcombine.high %v1103_v24, %v1119_v26  ;;  %v1143_v30 = vcombine.low %v1110_v25, %v1126_v27  ;;  %v1144_v31 = vcombine.high %v1110_v25, %v1126_v27 }
 0x52e   : > { %v1135_v32 = vrot.slane %v1127_v28, %v3174_v49  ;;  %v1142_v33 = vrot.slane %v1128_v29, %v3174_v49  ;;  %v1151_v35 = vrot.slane %v1143_v30, %v3174_v49  ;;  %v1158_v36 = vrot.slane %v1144_v31, %v3174_v49 }
 0x52f   : > { %v2551_v52 = vpop.eup %2550 }
 0x530   : > { %v1159_v38 = vcombine.high %v1135_v32, %v2808_v3  ;;  %v1160_v39 = vcombine.high %v1142_v33, %v2808_v3  ;;  %v1161_v40 = vcombine.high %v1151_v35, %v2808_v3  ;;  %v1162_v41 = vcombine.high %v1158_v36, %v2808_v3 }
 0x531   : > { %v2256_v42 = vpack.c.bf16 %v1151_v35, %v1135_v32  ;;  %v2257_v43 = vpack.c.bf16 %v1158_v36, %v1142_v33  ;;  %v2553_v55 = vpop.eup %2552  ;;  %v1460_v57 = vmul.f32 %v2551_v52, %v3266_v63  ;;  %v2533_v52 = vld [vmem:[#allocation10] sm:$0xff]  }
 0x532   : > { %v2258_v44 = vpack.c.bf16 %v1161_v40, %v1159_v38  ;;  %v2259_v45 = vpack.c.bf16 %v1162_v41, %v1160_v39  ;;  %v1461_v1 = vmul.f32 %v2553_v55, %v3270_v2 }
 0x533   : > { %v1178_v46 = vrot.slane %v2256_v42, %v3168_v37  ;;  %v1186_v47 = vrot.slane %v2257_v43, %v3168_v37  ;;  %v1464_v9 = vpack.c.bf16 %v1460_v57, %v1460_v57 }
 0x534   : > { %v1203_v48 = vrot.slane %v2258_v44, %v3168_v37  ;;  %v1211_v50 = vrot.slane %v2259_v45, %v3168_v37  ;;  %v1465_v12 = vpack.c.bf16 %v1461_v1, %v1461_v1 }
 0x535   : > { %v1187_v51 = vcombine.low %v1178_v46, %v1186_v47 }
 0x536   : > { %v1212_v53 = vcombine.low %v1203_v48, %v1211_v50 }
 0x537   : > { %v1194_v54 = vrot.slane %v1187_v51, %v3174_v49 }
 0x538   : > { %v1219_v56 = vrot.slane %v1212_v53, %v3174_v49 }
 0x539   : > { %v1195_v58 = vcombine.high %v1194_v54, %v2815_v20  ;;  %v1224_v60 = vshrl.u32 %v1194_v54, 16 }
 0x53a   : > { %v1223_v59 = vpack.i.b16 %v1219_v56, %v1194_v54  ;;  %v1225_v61 = vshrl.u32 %v1219_v56, 16  ;;  %v1220_v62 = vcombine.high %v1219_v56, %v2815_v20 }
 0x53b   : > { %v1230_v34 = vshrl.u32 %v1195_v58, 16 }
 0x53c   : > { %v1473_v4 = vsel %vm1471_vm3, %v1223_v59, 0  ;;  %v1226_v5 = vpack.i.b16 %v1225_v61, %v1224_v60  ;;  %v1229_v6 = vpack.i.b16 %v1220_v62, %v1195_v58  ;;  %v1231_v7 = vshrl.u32 %v1220_v62, 16 }
 0x53d   : > { %2375 = vmatpush3.bf16.msra.mxu1 %v1473_v4 }
 0x53e   : > { %v1519_v8 = vsel %vm1471_vm3, %v1226_v5, 0  ;;  %2386 = vmatprep.subr.bf16.mxu1 %v2808_v3  ;;  %v1232_v63 = vpack.i.b16 %v1231_v7, %v1230_v34  ;;  %v1565_v20 = vsel %vm1471_vm3, %v1229_v6, 0 }
 0x53f   : > { %2381 = vmatpush3.bf16.msra.mxu0 %v1519_v8 }
 0x540   : > { %2377 = vmatmul.mubr.msk.bf16.vlgmr.msra.gmra.mxu1 %vm1235_vm2, %v1464_v9  ;;  %2392 = vmatprep.subr.bf16.mxu0 %v2808_v3  ;;  %v1611_v2 = vsel %vm1471_vm3, %v1232_v63, 0 }
 0x541   : > { %2387 = vmatpush3.bf16.msra.mxu1 %v1565_v20  ;;  %2388 = vmatprep.mubr.msk.bf16.mxu1 %vm2809_vm1, %v2808_v3 }
 0x542   : > { %2383 = vmatmul.mubr.msk.bf16.vlgmr.msra.gmra.mxu0 %vm1235_vm2, %v1465_v12  ;;  %2398 = vmatprep.subr.bf16.mxu1 %v2808_v3 }
 0x543   : > { %2393 = vmatpush3.bf16.msra.mxu0 %v1611_v2  ;;  %2394 = vmatprep.mubr.msk.bf16.mxu0 %vm2809_vm1, %v2808_v3 }
 0x544   : > { %2406 = vmatprep.subr.bf16.mxu0 %v2808_v3 }
 0x556   : > { %v1452_v13 = vpop.xlane.xlu0 %1451 }
 0x557   : > { %2554 = vrcp.f32 %v1452_v13 }
 0x558   : > { %v1455_v14 = vpop.xlane.xlu1 %1454 }
 0x559   : > { %2556 = vrcp.f32 %v1455_v14 }
 0x564   : > { %v2555_v15 = vpop.eup %2554 }
 0x565   : > { %v1462_v16 = vmul.f32 %v2555_v15, %v3276_v10 }
 0x566   : > { %v2557_v17 = vpop.eup %2556 }
 0x567   : > { %v1466_v18 = vpack.c.bf16 %v1462_v16, %v1462_v16  ;;  %v1463_v19 = vmul.f32 %v2557_v17, %v3278_v11 }
 0x569   : > { %2389 = vmatmul.mubr.msk.bf16.vlgmr.msra.gmra.mxu1 %vm1235_vm2, %v1466_v18  ;;  %v1467_v21 = vpack.c.bf16 %v1463_v19, %v1463_v19 }
 0x56a   : > { %2402 = vmatprep.mubr.msk.bf16.mxu1 %vm2809_vm1, %v2808_v3  ;;  %2399 = vmatpush3.bf16.msra.mxu1 %v2532_v22 }
 0x56b   : > { %2395 = vmatmul.mubr.msk.bf16.vlgmr.msra.gmra.mxu0 %vm1235_vm2, %v1467_v21  ;;  %2400 = vmatprep.subr.bf16.mxu1 %v2808_v3  ;;  %v2270_v21 = vld [vmem:[%s3502_s28 + $0x3] ss:$0 sm:$0xff] }
 0x56c   : > { %2410 = vmatprep.mubr.msk.bf16.mxu0 %vm2809_vm1, %v2808_v3 }
 0x56e   : > { %2401 = vmatpush3.bf16.msra.mxu1 %v2533_v52 }
 0x56f   : > { %2414 = vmatprep.subr.bf16.mxu1 %v2808_v3 }
 0x600   : > { %v1509_v10 = vpop.f32.mrf.mxu1 }
 0x602   : > { %v2378_v23 = vpop.f32.mrf.mxu1  ;;  %v1555_v24 = vpop.f32.mrf.mxu0 }
 0x604   : > { %v1512_v25 = vpop.f32.mrf.mxu1  ;;  %v2384_v11 = vpop.f32.mrf.mxu0 }
 0x606   : > { %v2379_v26 = vpop.f32.mrf.mxu1  ;;  %v1558_v27 = vpop.f32.mrf.mxu0 }
 0x608   : > { %v2385_v28 = vpop.f32.mrf.mxu0 }
 0x629   : > { %v1601_v29 = vpop.f32.mrf.mxu1 }
 0x62a   : > { %v1653_v30 = vcombine.low %v1509_v10, %v1601_v29  ;;  %v1654_v31 = vcombine.high %v1509_v10, %v1601_v29 }
 0x62b   : > { %v2390_v32 = vpop.f32.mrf.mxu1  ;;  %v1647_v33 = vpop.f32.mrf.mxu0 }
 0x62c   : > { %v1669_v35 = vcombine.low %v1555_v24, %v1647_v33  ;;  %v1670_v36 = vcombine.high %v1555_v24, %v1647_v33  ;;  %v1661_v40 = vrot.slane %v1653_v30, %v3168_v37  ;;  %v1668_v41 = vrot.slane %v1654_v31, %v3168_v37  ;;  %v2534_v32 = vld [vmem:[#allocation11 + $0x8] sm:$0xff]   ;;  %v2535_v33 = vld [vmem:[#allocation11] sm:$0xff]  }
 0x62d   : > { %v1604_v38 = vpop.f32.mrf.mxu1  ;;  %v2396_v39 = vpop.f32.mrf.mxu0  ;;  %2407 = vmatpush3.bf16.msra.mxu0 %v2534_v32 }
 0x62e   : > { %v1677_v42 = vrot.slane %v1669_v35, %v3168_v37  ;;  %v1684_v43 = vrot.slane %v1670_v36, %v3168_v37  ;;  %2408 = vmatprep.subr.bf16.mxu0 %v2808_v3  ;;  %v2537_v35 = vld [vmem:[%s3503_s20 + $0x10] sm:$0xff]  }
 0x62f   : > { %v2391_v44 = vpop.f32.mrf.mxu1  ;;  %v1650_v45 = vpop.f32.mrf.mxu0 }
 0x630   : > { %v1685_v46 = vcombine.low %v1661_v40, %v1677_v42  ;;  %v1686_v47 = vcombine.high %v1661_v40, %v1677_v42  ;;  %v1701_v48 = vcombine.low %v1668_v41, %v1684_v43  ;;  %v1702_v50 = vcombine.high %v1668_v41, %v1684_v43  ;;  %v2274_v41 = vld [vmem:[%s3502_s28 + $0x7] ss:$0 sm:$0xff]  ;;  %v2275_v43 = vld [vmem:[%s3502_s28 + $0x8] ss:$0 sm:$0xff] }
 0x631   : > { %v2397_v51 = vpop.f32.mrf.mxu0  ;;  %2409 = vmatpush3.bf16.msra.mxu0 %v2535_v33 }
 0x632   : > { %v1693_v53 = vrot.slane %v1685_v46, %v3174_v49  ;;  %v1700_v54 = vrot.slane %v1686_v47, %v3174_v49  ;;  %v1709_v55 = vrot.slane %v1701_v48, %v3174_v49  ;;  %v1716_v56 = vrot.slane %v1702_v50, %v3174_v49  ;;  %v2538_v47 = vld [vmem:[%s3503_s20 + $0x8] sm:$0xff]   ;;  %v2539_v48 = vld [vmem:[%s3503_s20] sm:$0xff]  }
 0x634   : > { %v1721_v57 = vcombine.low %v1693_v53, %v1700_v54  ;;  %v2268_v58 = vcombine.high %v1693_v53, %v1700_v54  ;;  %v1737_v59 = vcombine.low %v1709_v55, %v1716_v56  ;;  %v2269_v60 = vcombine.high %v1709_v55, %v1716_v56 }
 0x636   : > { %v1728_v61 = vrot.slane %v1721_v57, %v3168_v37  ;;  %v1736_v62 = vrot.slane %v2268_v58, %v3168_v37  ;;  %v1744_v1 = vrot.slane %v1737_v59, %v3168_v37  ;;  %v1752_v34 = vrot.slane %v2269_v60, %v3168_v37 }
 0x638   : > { %v1754_v4 = vcombine.high %v1728_v61, %v1736_v62  ;;  %v1770_v5 = vcombine.high %v1744_v1, %v1752_v34  ;;  %v1753_v6 = vcombine.low %v1728_v61, %v1736_v62  ;;  %v1769_v7 = vcombine.low %v1744_v1, %v1752_v34 }
 0x63a   : > { %v1768_v8 = vrot.slane %v1754_v4, %v3174_v49  ;;  %v1784_v9 = vrot.slane %v1770_v5, %v3174_v49  ;;  %v1761_v63 = vrot.slane %v1753_v6, %v3174_v49  ;;  %v1777_v20 = vrot.slane %v1769_v7, %v3174_v49 }
 0x63c   : > { %v1787_v12 = vcombine.low %v1768_v8, %v1784_v9  ;;  %v1786_v2 = vcombine.high %v1761_v63, %v1777_v20  ;;  %v1785_v13 = vcombine.low %v1761_v63, %v1777_v20  ;;  %v1788_v37 = vcombine.high %v1768_v8, %v1784_v9 }
 0x63e   : > { %1794 = vrot.lane.b32.xlu1 %v1787_v12, %s2816_s24  ;;  %1790 = vrot.lane.b32.xlu0 %v1786_v2, %s2817_s21  ;;  %s3504_s21 = sld [smem:[#allocation29_spill]] }
 0x642   : > { %1798 = vrot.lane.b32.xlu0 %v1788_v37, %s2818_s12  ;;  %s2232_s12 = sshll.u32 %s3089_s18, 3 }
 0x643   : > { %s556_s29 = scalar_lea.vmem [#allocation13], %s2232_s12 }
 0x644   : > { %v2276_v50 = vld [vmem:[%s3504_s21] ss:$0 sm:$0xff]  ;;  %s2059_s2 = sshll.u32 %s556_s29, 4  ;;  %s3392_s2 = int_to_ptr.vmem [resolvable:$true] %s2059_s2 }
 0x645   : > { %s2722_s10 = scalar_lea.vmem %s3392_s2, 128  ;;  %p2729_p4 = scmp.lt.s32.totalorder %s3392_s2, %s2727_s6 }
 0x646   : > { %p2723_p7 = scmp.ne.s32.totalorder %s3392_s2, %s2722_s10  ;;  %p2730_p8 = scmp.lt.s32.totalorder %s2728_s14, %s2722_s10 }
 0x648   : > { %p2724_p3 = pnand %p2723_p7, %p3507_p0  ;;  %p2731_p11 = por %p2730_p8, %p2729_p4 }
 0x64a   : > { %p2725_p6 = pneg %p2724_p3 }
 0x64c   : > { %p2732_p5 = pnand %p2731_p11, %p2725_p6 }
 0x6b0   : > { %v1791_v14 = vpop.permute.xlu0 %1790  ;;  %v1795_v15 = vpop.permute.xlu1 %1794 }
 0x6b1   : > { %v1801_v16 = vsel %vm1235_vm2, %v1785_v13, %v1791_v14 }
 0x6b2   : > { %v1803_v18 = vsel %vm1802_vm4, %v1801_v16, %v1795_v15 }
 0x6b4   : > { %v1799_v17 = vpop.permute.xlu0 %1798 }
 0x6b5   : > { %v1805_v19 = vsel %vm1804_vm5, %v1803_v18, %v1799_v17 }
 0x6b6   : > { %v1806_v49 = vpack.c.bf16 %v1805_v19, %v1805_v19 }
 0x6b8   : > { %2403 = vmatmul.mubr.msk.bf16.vlgmr.msra.gmra.mxu1 %vm574_vm0, %v1806_v49 }
 0x6b9   : > { %2422 = vmatprep.mubr.msk.bf16.mxu1 %vm2809_vm1, %v2808_v3 }
 0x778   : > { %v1864_v22 = vpop.f32.mrf.mxu1 }
 0x779   : > { %v1865_v10 = vadd.f32 %v2270_v21, %v1864_v22 }
 0x77a   : > { %v2404_v23 = vpop.f32.mrf.mxu1 }
 0x77b   : > { %v1870_v24 = vadd.f32 %v1865_v10, %v3120_v0  ;;  %v2536_v0 = vld [vmem:[%s3503_s20 + $0x18] sm:$0xff]  }
 0x77c   : > { %v1867_v25 = vpop.f32.mrf.mxu1  ;;  %2415 = vmatpush3.bf16.msra.mxu1 %v2536_v0 }
 0x77d   : > { %v1871_v11 = vsel %vm574_vm0, %v1870_v24, 0.0  ;;  %2416 = vmatprep.subr.bf16.mxu1 %v2808_v3 }
 0x77e   : > { %1872 = vadd.xlane.f32.xlu1 %v1871_v11  ;;  %v2405_v26 = vpop.f32.mrf.mxu1 }
 0x780   : > { %2417 = vmatpush3.bf16.msra.mxu1 %v2537_v35 }
 0x781   : > { %2418 = vmatprep.subr.bf16.mxu1 %v2808_v3 }
 0x784   : > { %2419 = vmatpush3.bf16.msra.mxu1 %v2538_v47 }
 0x785   : > { %2420 = vmatprep.subr.bf16.mxu1 %v2808_v3  ;;  %v2280_v3 = vld [vmem:[%s3502_s28 + $0x4] ss:$0 sm:$0xff] }
 0x788   : > { %2421 = vmatpush3.bf16.msra.mxu1 %v2539_v48 }
 0x807   : > { %v1873_v27 = vpop.xlane.xlu1 %1872 }
 0x808   : > { %v1874_v28 = vmul.f32 0.03125, %v1873_v27 }
 0x80a   : > { %v1875_v29 = vsub.f32 %v1870_v24, %v1874_v28 }
 0x80c   : > { %v1876_v30 = vmul.f32 %v1875_v29, %v1875_v29 }
 0x80e   : > { %v1877_v31 = vsel %vm574_vm0, %v1876_v30, 0.0 }
 0x80f   : > { %1878 = vadd.xlane.f32.xlu0 %v1877_v31 }
 0x898   : > { %v1879_v36 = vpop.xlane.xlu0 %1878 }
 0x899   : > { %v1880_v38 = vmul.f32 0.03125, %v1879_v36 }
 0x89b   : > { %v1881_v39 = vadd.f32 1e-05, %v1880_v38 }
 0x89d   : > { %2558 = vrsqrt.f32 %v1881_v39 }
 0x8aa   : > { %v2559_v40 = vpop.eup %2558 }
 0x8ab   : > { %v1883_v42 = vmul.f32 %v2559_v40, %v1875_v29 }
 0x8ad   : > { %v1888_v44 = vmul.f32 %v2274_v41, %v1883_v42 }
 0x8af   : > { %v1893_v45 = vadd.f32 %v2275_v43, %v1888_v44 }
 0x8b1   : > { %v1894_v46 = vpack.c.bf16 %v1893_v45, %v1893_v45 }
 0x8b3   : > { %2411 = vmatmul.mubr.msk.bf16.vlgmr.msra.gmra.mxu0 %vm574_vm0, %v1894_v46 }
 0x973   : > { %v1955_v51 = vpop.f32.mrf.mxu0 }
 0x974   : > { %v1956_v52 = vadd.f32 %v2276_v50, %v1955_v51 }
 0x975   : > { %v2412_v53 = vpop.f32.mrf.mxu0 }
 0x976   : > { %v1961_v54 = vmax.f32 %v1956_v52, 0.0 }
 0x977   : > { %v1958_v55 = vpop.f32.mrf.mxu0 }
 0x978   : > { %v1962_v56 = vpack.c.bf16 %v1961_v54, %v1961_v54 }
 0x979   : > { %v2413_v57 = vpop.f32.mrf.mxu0 }
 0x97a   : > { %2423 = vmatmul.mubr.msk.bf16.vlgmr.msra.gmra.mxu1 %vm1999_vm6, %v1962_v56 }
 0xa3a   : > { %v2037_v58 = vpop.f32.mrf.mxu1 }
 0xa3b   : > { %v2038_v59 = vadd.f32 %v2280_v3, %v2037_v58 }
 0xa3c   : > { %v2424_v60 = vpop.f32.mrf.mxu1 }
 0xa3d   : > { %v2043_v61 = vadd.f32 %v2038_v59, %v1870_v24 }
 0xa3e   : > { %v2040_v62 = vpop.f32.mrf.mxu1 }
 0xa3f   : > { %2044 = vst.msk [vmem:[%s556_s29] sm:$0xff] %vm574_vm0, %v2043_v61 }
 0xa40   : > { %v2425_v1 = vpop.f32.mrf.mxu1 }
 0xa41   : > { %2735 = shalt.err (!%p2732_p5)
}
 0xa42   : > { %s2736_s30 = scalar_lea.hbm %s3390_s9, 128  ;;  %s2740_s21 = scalar_lea.hbm %s3506_s17, 256 }
 0xa43   : > { %p2737_p10 = scmp.ne.s32.totalorder %s3390_s9, %s2736_s30  ;;  %p2741_p13 = scmp.lt.s32.totalorder %s3390_s9, %s3506_s17 }
 0xa44   : > { %p2742_p1 = scmp.lt.s32.totalorder %s2740_s21, %s2736_s30 }
 0xa45   : > { %p2738_p9 = pnand %p2737_p10, %p3507_p0 }
 0xa46   : > { %p2743_p12 = por %p2742_p1, %p2741_p13 }
 0xa47   : > { %p2739_p2 = pneg %p2738_p9 }
 0xa49   : > { %p2744_p7 = pnand %p2743_p12, %p2739_p2 }
 0xa4b   : > { %2747 = shalt.err (!%p2744_p7)
}
 0xa4c   : > { %2444 = dma.vmem_to_hbm [thread:$0]  (%p3507_p0), %s3392_s2, 128, %s3390_s9, %s2046_s25  }
 0xa4d PF: > { %s3508_s26 = sld [smem:[#allocation19_spill]] }
 0xa4e   : > { %s3509_s11 = sld [smem:[#allocation21_spill]] }
 0xa4f   : > { %s3510_s29 = sld [smem:[#allocation20_spill]] }
 0xa53   : > { %s2071_s27 = sand.u32 1, %s3508_s26  }
 0xa54   : > { %p3511_p3 = scmp.ne.s32.totalorder %s3509_s11, 0  ;;  %s2072_s19 = scalar_lea.sflag [#allocation4], %s2071_s27 }
 0xa55   : > { %p3512_p6 = scmp.ge.s32.totalorder %s3510_s29, 2 }
 0xa57   : > { %p2467_p4 = pnand %p3512_p6, %p3511_p3 }
 0xa59   : > { %p2468_p8 = pneg %p2467_p4 }
 0xa5b   : > { %2781 = dma.done.wait (%p2468_p8), %s2072_s19, 128  }
 0xa5c   : > { %2783 = vsyncadd (%p2468_p8), %s2072_s19, 4294967168  ;;  %s3513_s24 = sld [smem:[#allocation22_spill]]  ;;  %s3515_s21 = smov %s2790_s22 }
 0xa5d   : > { %s3514_s10 = sld [smem:[#allocation23_spill]]  ;;  %s3516_s22 = smov %s2794_s23 }
 0xa62   : > { %p30_p11 = scmp.ge.s32.totalorder %s3513_s24, 4  }
 0xa63   : > { %s3517_s23 = smov %s3514_s10 }
 0xa64   :  { %32 = sbr.rel (!%p30_p11) target bundleno = 16 (0x10), region = 152 }
 0xa69   :  { %2077 = vsyncpa [#allocation3], 1 }
 0xa6a   :  { %2079 = vsyncpa [#allocation3 + $0x1], 1 }
 0xa6b   :  { %2080 = vsyncpa [#allocation6], 1 }
 0xa6c   :  { %2082 = vsyncpa [#allocation6 + $0x1], 1 }
 0xa6d   :  { %2083 = vsyncpa [#allocation9], 1 }
 0xa6e   :  { %2084 = vsyncpa [#allocation12], 1 }
 0xa6f   :  { %2085 = vsyncpa [#allocation4], 1 }
 0xa70   :  { %2087 = vsyncpa [#allocation4 + $0x1], 1 }

</bundles_post_ra>
